<compile_context>
chip_gen: v7x
topology: tpu7x:2x2x1
jax: 0.10.0
libtpu: 0.0.40
codegen_flags: <defaults>
</compile_context>

<pallas_src>
import jax
import jax.numpy as jnp
from jax.experimental import pallas as pl
from jax.experimental.pallas import tpu as pltpu


# ---------------------------------------------------------------------------
# Fused self-attention kernel: one (batch, query-block) per grid step
# ---------------------------------------------------------------------------
def _self_attn_kernel(x_cn_ref, x_q_cn_ref, wq_ref, bq_ref, wkT_ref, bk_ref,
                      wv_ref, bv_ref, out_ref, attn_ref):
    # x_cn_ref   : (C, N)   f32  channel-major input (full, for K and V)
    # x_q_cn_ref : (C, TQ)  f32  query-block window of the same input
    # wq_ref     : (C, P)   bf16 query weights (matmul form, zero-padded lanes)
    # bq_ref     : (1, P)   f32  query bias (padded)
    # wkT_ref    : (P, C)   bf16 key weights (rows padded) -> yields K^T directly
    # bk_ref     : (P, 1)   f32  key bias (padded)
    # wv_ref     : (C, C)   bf16 value weights * gamma (folded)
    # bv_ref     : (C, 1)   f32  value bias * gamma (folded)
    # out_ref    : (C, TQ)  f32  residual output, channel-major (lane-dense)
    # attn_ref   : (TQ, N)       attention rows for this query block (lane-dense)
    x_cn = x_cn_ref[...]                                              # (C, N) f32
    x_bf = x_cn.astype(jnp.bfloat16)                                  # MXU operand

    # K^T = Wk @ x   (zero-padded rows stay exactly 0)                -- MXU bf16
    kT = jnp.dot(wkT_ref[...], x_bf,
                 preferred_element_type=jnp.float32) + bk_ref[...]    # (P, N) f32

    # V (gamma folded) channel-major, then tokens-major for attn @ V  -- MXU bf16
    v_cn = jnp.dot(wv_ref[...], x_bf,
                   preferred_element_type=jnp.float32) + bv_ref[...]  # (C, N) f32
    v_nc = jnp.transpose(v_cn, (1, 0)).astype(jnp.bfloat16)           # (N, C) bf16

    # Q for this query-row block only (small XLU transpose of (C, TQ)).
    x_q_cn = x_q_cn_ref[...]                                          # (C, TQ) f32
    x_q_nc = jnp.transpose(x_q_cn, (1, 0)).astype(jnp.bfloat16)       # (TQ, C) bf16
    q = jnp.dot(x_q_nc, wq_ref[...],
                preferred_element_type=jnp.float32) + bq_ref[...]     # (TQ, P) f32

    # energy[i, j] = <q_i, k_j>   (padded channels contribute exactly 0)
    energy = jnp.dot(q.astype(jnp.bfloat16), kT.astype(jnp.bfloat16),
                     preferred_element_type=jnp.float32)              # (TQ, N) f32

    # Row softmax over key positions: XLU reduce + EUP exp + EUP approx recip.
    m = jnp.max(energy, axis=-1, keepdims=True)
    e = jnp.exp(energy - m)
    attn = e * pl.reciprocal(jnp.sum(e, axis=-1, keepdims=True), approx=True)

    # out = attn @ (gamma * V); transpose to channel-major, add residual (f32).
    out_nc = jnp.dot(attn.astype(jnp.bfloat16), v_nc,
                     preferred_element_type=jnp.float32)              # (TQ, C) f32
    out_ref[...] = (jnp.transpose(out_nc, (1, 0)) + x_q_cn).astype(out_ref.dtype)
    attn_ref[...] = attn.astype(attn_ref.dtype)


# ---------------------------------------------------------------------------
# Wrapper: NCHW in / (NCHW, attention) out, weights in PyTorch-like layout
# ---------------------------------------------------------------------------
def self_attn_forward(x_nchw, params, *, tq=128, attn_dtype=jnp.float32):
    """x_nchw: (B, C, W, H) f32.  Returns (out (B, C, W, H), attention (B, N, N)).

    `attn_dtype=jnp.bfloat16` halves the dominant (B, N, N) HBM writeback if the
    caller tolerates bf16 attention; default f32 preserves module semantics.
    """
    B, C, W, H = x_nchw.shape
    N = W * H
    C8 = params["wq"].shape[0]                     # in_dim // 8
    P = max(128, ((C8 + 127) // 128) * 128)        # lane-dense padded q/k width

    # Query-row block: 128-row tiles when divisible, else one full block.
    TQ = tq if (0 < tq <= N and N % tq == 0) else N

    # Only a free reshape (PyTorch .view layout) -- no wrapper-side transpose.
    x_cn = x_nchw.reshape(B, C, N).astype(jnp.float32)

    gamma = params["gamma"].reshape(()).astype(jnp.float32)

    # query: (C8, C) -> matmul form (C, C8), zero-padded to (C, P), bf16
    wq = jnp.transpose(params["wq"].astype(jnp.float32), (1, 0))
    wq = jnp.pad(wq, ((0, 0), (0, P - C8))).astype(jnp.bfloat16)
    bq = jnp.pad(params["bq"].astype(jnp.float32), (0, P - C8)).reshape(1, P)

    # key: keep (C8, C), zero-pad rows to (P, C) -> produces K^T directly, bf16
    wkT = jnp.pad(params["wk"].astype(jnp.float32),
                  ((0, P - C8), (0, 0))).astype(jnp.bfloat16)
    bk = jnp.pad(params["bk"].astype(jnp.float32), (0, P - C8)).reshape(P, 1)

    # value: fold gamma, keep (C_out, C_in) for the channel-major matmul, bf16
    wv = (gamma * params["wv"].astype(jnp.float32)).astype(jnp.bfloat16)
    bv = (gamma * params["bv"].astype(jnp.float32)).reshape(C, 1)

    out_cn, attn = pl.pallas_call(
        _self_attn_kernel,
        out_shape=(jax.ShapeDtypeStruct((B, C, N), jnp.float32),
                   jax.ShapeDtypeStruct((B, N, N), attn_dtype)),
        grid=(B, N // TQ),
        in_specs=[
            pl.BlockSpec((None, C, N), lambda b, qi: (b, 0, 0)),    # x (full)
            pl.BlockSpec((None, C, TQ), lambda b, qi: (b, 0, qi)),  # x (query block)
            pl.BlockSpec((C, P), lambda b, qi: (0, 0)),             # wq
            pl.BlockSpec((1, P), lambda b, qi: (0, 0)),             # bq
            pl.BlockSpec((P, C), lambda b, qi: (0, 0)),             # wk^T
            pl.BlockSpec((P, 1), lambda b, qi: (0, 0)),             # bk
            pl.BlockSpec((C, C), lambda b, qi: (0, 0)),             # wv * gamma
            pl.BlockSpec((C, 1), lambda b, qi: (0, 0)),             # bv * gamma
        ],
        out_specs=(
            pl.BlockSpec((None, C, TQ), lambda b, qi: (b, 0, qi)),  # residual out
            pl.BlockSpec((None, TQ, N), lambda b, qi: (b, qi, 0)),  # attention rows
        ),
        compiler_params=pltpu.CompilerParams(
            dimension_semantics=("parallel", "parallel"),
            vmem_limit_bytes=32 * 1024 * 1024),
    )(x_cn, x_cn, wq, bq, wkT, bk, wv, bv)

    # Channel-major output -> NCHW is a free reshape (no transpose pass).
    return out_cn.reshape(B, C, W, H), attn


# ---------------------------------------------------------------------------
# Pure-JAX reference (mirrors the PyTorch forward exactly, f32)
# ---------------------------------------------------------------------------
def self_attn_reference(x_nchw, params):
    B, C, W, H = x_nchw.shape
    N = W * H
    x_cn = x_nchw.reshape(B, C, N).astype(jnp.float32)

    def conv1x1(w, b):
        return jnp.einsum("oc,bcn->bon", w, x_cn) + b[None, :, None]

    q = conv1x1(params["wq"], params["bq"])        # (B, C8, N)
    k = conv1x1(params["wk"], params["bk"])        # (B, C8, N)
    v = conv1x1(params["wv"], params["bv"])        # (B, C,  N)
    energy = jnp.einsum("bci,bcj->bij", q, k)      # (B, N, N)
    attn = jax.nn.softmax(energy, axis=-1)
    out = jnp.einsum("bij,bcj->bci", attn, v)      # (B, C, N)
    out = params["gamma"].reshape(()) * out + x_cn
    return out.reshape(B, C, W, H), attn


# ---------------------------------------------------------------------------
if __name__ == "__main__":
    key = jax.random.PRNGKey(0)
    kx, kq, kk, kv, kb1, kb2, kb3 = jax.random.split(key, 7)

    B, C, W, H = 2, 32, 16, 16          # in_dim = 32 (needs in_dim >= 8), N = 256
    C8 = C // 8

    x = jax.random.normal(kx, (B, C, W, H), jnp.float32)
    params = {
        "wq": 0.1 * jax.random.normal(kq, (C8, C), jnp.float32),   # Conv2d(C, C//8, 1)
        "bq": 0.1 * jax.random.normal(kb1, (C8,), jnp.float32),
        "wk": 0.1 * jax.random.normal(kk, (C8, C), jnp.float32),   # Conv2d(C, C//8, 1)
        "bk": 0.1 * jax.random.normal(kb2, (C8,), jnp.float32),
        "wv": 0.1 * jax.random.normal(kv, (C, C), jnp.float32),    # Conv2d(C, C, 1)
        "bv": 0.1 * jax.random.normal(kb3, (C,), jnp.float32),
        # PyTorch initializes gamma = 0 (out == x); use a nonzero value so the
        # attention path is actually exercised by the check.
        "gamma": jnp.array([0.5], jnp.float32),
    }

    out, attn = self_attn_forward(x, params)
    out = jax.block_until_ready(out)
    attn = jax.block_until_ready(attn)
    assert out.shape == (B, C, W, H), out.shape
    assert attn.shape == (B, W * H, W * H), attn.shape

    out_ref, attn_ref = self_attn_reference(x, params)
    out_ref = jax.block_until_ready(out_ref)
    assert jnp.allclose(out, out_ref, rtol=2e-3, atol=2e-3), (
        float(jnp.max(jnp.abs(out - out_ref))))
    assert jnp.allclose(attn, attn_ref, rtol=2e-3, atol=2e-3), (
        float(jnp.max(jnp.abs(attn - attn_ref))))

    print("KERNEL_OK")
</pallas_src>

<mosaic_0001>
module attributes {stable_mosaic.version = 11 : i64} {
  func.func @_self_attn_kernel(%arg0: i32, %arg1: i32, %arg2: memref<1x32x256xf32, #tpu.memory_space<vmem>>, %arg3: memref<1x32x128xf32, #tpu.memory_space<vmem>>, %arg4: memref<32x128xbf16, #tpu.memory_space<vmem>>, %arg5: memref<1x128xf32, #tpu.memory_space<vmem>>, %arg6: memref<128x32xbf16, #tpu.memory_space<vmem>>, %arg7: memref<128x1xf32, #tpu.memory_space<vmem>>, %arg8: memref<32x32xbf16, #tpu.memory_space<vmem>>, %arg9: memref<32x1xf32, #tpu.memory_space<vmem>>, %arg10: memref<1x32x128xf32, #tpu.memory_space<vmem>>, %arg11: memref<1x128x256xf32, #tpu.memory_space<vmem>>) attributes {dimension_semantics = [#tpu.dimension_semantics<parallel>, #tpu.dimension_semantics<parallel>], iteration_bounds = array<i64: 2, 2>, scalar_prefetch = 0 : i64, scratch_operands = 0 : i64, tpu.core_type = #tpu.core_type<tc>, window_params = [{transform_indices = @transform_0, window_bounds = array<i64: 1, 32, 256>}, {transform_indices = @transform_1, window_bounds = array<i64: 1, 32, 128>}, {pipeline_mode = #tpu.pipeline_mode<synchronous>, transform_indices = @transform_2, window_bounds = array<i64: 32, 128>}, {pipeline_mode = #tpu.pipeline_mode<synchronous>, transform_indices = @transform_3, window_bounds = array<i64: 1, 128>}, {pipeline_mode = #tpu.pipeline_mode<synchronous>, transform_indices = @transform_4, window_bounds = array<i64: 128, 32>}, {pipeline_mode = #tpu.pipeline_mode<synchronous>, transform_indices = @transform_5, window_bounds = array<i64: 128, 1>}, {pipeline_mode = #tpu.pipeline_mode<synchronous>, transform_indices = @transform_6, window_bounds = array<i64: 32, 32>}, {pipeline_mode = #tpu.pipeline_mode<synchronous>, transform_indices = @transform_7, window_bounds = array<i64: 32, 1>}, {transform_indices = @transform_8, window_bounds = array<i64: 1, 32, 128>}, {transform_indices = @transform_9, window_bounds = array<i64: 1, 128, 256>}]} {
    %c0 = arith.constant 0 : index
    %c0_0 = arith.constant 0 : index
    %c0_1 = arith.constant 0 : index
    %0 = vector.load %arg2[%c0, %c0_0, %c0_1] : memref<1x32x256xf32, #tpu.memory_space<vmem>>, vector<1x32x256xf32>
    %1 = vector.shape_cast %0 : vector<1x32x256xf32> to vector<32x256xf32>
    %2 = arith.truncf %1 : vector<32x256xf32> to vector<32x256xbf16>
    %c0_2 = arith.constant 0 : index
    %c0_3 = arith.constant 0 : index
    %3 = vector.load %arg6[%c0_2, %c0_3] : memref<128x32xbf16, #tpu.memory_space<vmem>>, vector<128x32xbf16>
    %cst = arith.constant dense<0.000000e+00> : vector<128x256xf32>
    %4 = tpu.matmul %3, %2, %cst {dimension_numbers = #tpu.dot_dimension_numbers<[1], [0], [0], [1], [0, 0, 1, 1], [], []>} : vector<128x32xbf16>, vector<32x256xbf16>, vector<128x256xf32> -> vector<128x256xf32>
    %c0_4 = arith.constant 0 : index
    %c0_5 = arith.constant 0 : index
    %5 = vector.load %arg7[%c0_4, %c0_5] : memref<128x1xf32, #tpu.memory_space<vmem>>, vector<128x1xf32>
    %6 = vector.broadcast %5 : vector<128x1xf32> to vector<128x256xf32>
    %7 = arith.addf %4, %6 : vector<128x256xf32>
    %c0_6 = arith.constant 0 : index
    %c0_7 = arith.constant 0 : index
    %8 = vector.load %arg8[%c0_6, %c0_7] : memref<32x32xbf16, #tpu.memory_space<vmem>>, vector<32x32xbf16>
    %cst_8 = arith.constant dense<0.000000e+00> : vector<32x256xf32>
    %9 = tpu.matmul %8, %2, %cst_8 {dimension_numbers = #tpu.dot_dimension_numbers<[1], [0], [0], [1], [0, 0, 1, 1], [], []>} : vector<32x32xbf16>, vector<32x256xbf16>, vector<32x256xf32> -> vector<32x256xf32>
    %c0_9 = arith.constant 0 : index
    %c0_10 = arith.constant 0 : index
    %10 = vector.load %arg9[%c0_9, %c0_10] : memref<32x1xf32, #tpu.memory_space<vmem>>, vector<32x1xf32>
    %11 = vector.broadcast %10 : vector<32x1xf32> to vector<32x256xf32>
    %12 = arith.addf %9, %11 : vector<32x256xf32>
    %13 = tpu.transpose %12, [1, 0] : vector<32x256xf32> -> vector<256x32xf32>
    %14 = arith.truncf %13 : vector<256x32xf32> to vector<256x32xbf16>
    %c0_11 = arith.constant 0 : index
    %c0_12 = arith.constant 0 : index
    %c0_13 = arith.constant 0 : index
    %15 = vector.load %arg3[%c0_11, %c0_12, %c0_13] : memref<1x32x128xf32, #tpu.memory_space<vmem>>, vector<1x32x128xf32>
    %16 = vector.shape_cast %15 : vector<1x32x128xf32> to vector<32x128xf32>
    %17 = tpu.transpose %16, [1, 0] : vector<32x128xf32> -> vector<128x32xf32>
    %18 = arith.truncf %17 : vector<128x32xf32> to vector<128x32xbf16>
    %c0_14 = arith.constant 0 : index
    %c0_15 = arith.constant 0 : index
    %19 = vector.load %arg4[%c0_14, %c0_15] : memref<32x128xbf16, #tpu.memory_space<vmem>>, vector<32x128xbf16>
    %cst_16 = arith.constant dense<0.000000e+00> : vector<128x128xf32>
    %20 = tpu.matmul %18, %19, %cst_16 {dimension_numbers = #tpu.dot_dimension_numbers<[1], [0], [0], [1], [0, 0, 1, 1], [], []>} : vector<128x32xbf16>, vector<32x128xbf16>, vector<128x128xf32> -> vector<128x128xf32>
    %c0_17 = arith.constant 0 : index
    %c0_18 = arith.constant 0 : index
    %21 = vector.load %arg5[%c0_17, %c0_18] : memref<1x128xf32, #tpu.memory_space<vmem>>, vector<1x128xf32>
    %22 = vector.broadcast %21 : vector<1x128xf32> to vector<128x128xf32>
    %23 = arith.addf %20, %22 : vector<128x128xf32>
    %24 = arith.truncf %23 : vector<128x128xf32> to vector<128x128xbf16>
    %25 = arith.truncf %7 : vector<128x256xf32> to vector<128x256xbf16>
    %cst_19 = arith.constant dense<0.000000e+00> : vector<128x256xf32>
    %26 = tpu.matmul %24, %25, %cst_19 {dimension_numbers = #tpu.dot_dimension_numbers<[1], [0], [0], [1], [0, 0, 1, 1], [], []>} : vector<128x128xbf16>, vector<128x256xbf16>, vector<128x256xf32> -> vector<128x256xf32>
    %cst_20 = arith.constant dense<0xFF800000> : vector<128xf32>
    %27 = vector.multi_reduction <maximumf>, %26, %cst_20 [1] : vector<128x256xf32> to vector<128xf32>
    %28 = vector.shape_cast %27 : vector<128xf32> to vector<128x1xf32>
    %29 = vector.broadcast %28 : vector<128x1xf32> to vector<128x256xf32>
    %30 = arith.subf %26, %29 : vector<128x256xf32>
    %31 = math.exp %30 : vector<128x256xf32>
    %cst_21 = arith.constant dense<0.000000e+00> : vector<128xf32>
    %32 = vector.multi_reduction <add>, %31, %cst_21 [1] : vector<128x256xf32> to vector<128xf32>
    %33 = vector.shape_cast %32 : vector<128xf32> to vector<128x1xf32>
    %34 = tpu.reciprocal %33 {approx = true} : vector<128x1xf32> -> vector<128x1xf32>
    %35 = vector.broadcast %34 : vector<128x1xf32> to vector<128x256xf32>
    %36 = arith.mulf %31, %35 : vector<128x256xf32>
    %37 = arith.truncf %36 : vector<128x256xf32> to vector<128x256xbf16>
    %cst_22 = arith.constant dense<0.000000e+00> : vector<128x32xf32>
    %38 = tpu.matmul %37, %14, %cst_22 {dimension_numbers = #tpu.dot_dimension_numbers<[1], [0], [0], [1], [0, 0, 1, 1], [], []>} : vector<128x256xbf16>, vector<256x32xbf16>, vector<128x32xf32> -> vector<128x32xf32>
    %39 = tpu.transpose %38, [1, 0] : vector<128x32xf32> -> vector<32x128xf32>
    %40 = arith.addf %39, %16 : vector<32x128xf32>
    %c0_23 = arith.constant 0 : index
    %c0_24 = arith.constant 0 : index
    %c0_25 = arith.constant 0 : index
    %41 = vector.load %arg10[%c0_23, %c0_24, %c0_25] : memref<1x32x128xf32, #tpu.memory_space<vmem>>, vector<1x32x128xf32>
    %42 = vector.shape_cast %41 : vector<1x32x128xf32> to vector<32x128xf32>
    %43 = vector.shape_cast %40 : vector<32x128xf32> to vector<1x32x128xf32>
    tpu.vector_store %arg10[%c0_23, %c0_24, %c0_25], %43 {strides = array<i32>} : memref<1x32x128xf32, #tpu.memory_space<vmem>>, vector<1x32x128xf32>,
    %c0_26 = arith.constant 0 : index
    %c0_27 = arith.constant 0 : index
    %c0_28 = arith.constant 0 : index
    %44 = vector.load %arg11[%c0_26, %c0_27, %c0_28] : memref<1x128x256xf32, #tpu.memory_space<vmem>>, vector<1x128x256xf32>
    %45 = vector.shape_cast %44 : vector<1x128x256xf32> to vector<128x256xf32>
    %46 = vector.shape_cast %36 : vector<128x256xf32> to vector<1x128x256xf32>
    tpu.vector_store %arg11[%c0_26, %c0_27, %c0_28], %46 {strides = array<i32>} : memref<1x128x256xf32, #tpu.memory_space<vmem>>, vector<1x128x256xf32>,
    return
  }
  func.func @transform_0(%arg0: i32, %arg1: i32) -> (i32, i32, i32) {
    %c0_i32 = arith.constant 0 : i32
    %c0_i32_0 = arith.constant 0 : i32
    %c0_i32_1 = arith.constant 0 : i32
    return %arg0, %c0_i32, %c0_i32_0 : i32, i32, i32
  }
  func.func @transform_1(%arg0: i32, %arg1: i32) -> (i32, i32, i32) {
    %c0_i32 = arith.constant 0 : i32
    %c0_i32_0 = arith.constant 0 : i32
    return %arg0, %c0_i32, %arg1 : i32, i32, i32
  }
  func.func @transform_2(%arg0: i32, %arg1: i32) -> (i32, i32) {
    %c0_i32 = arith.constant 0 : i32
    %c0_i32_0 = arith.constant 0 : i32
    %c0_i32_1 = arith.constant 0 : i32
    return %c0_i32, %c0_i32_0 : i32, i32
  }
  func.func @transform_3(%arg0: i32, %arg1: i32) -> (i32, i32) {
    %c0_i32 = arith.constant 0 : i32
    %c0_i32_0 = arith.constant 0 : i32
    %c0_i32_1 = arith.constant 0 : i32
    return %c0_i32, %c0_i32_0 : i32, i32
  }
  func.func @transform_4(%arg0: i32, %arg1: i32) -> (i32, i32) {
    %c0_i32 = arith.constant 0 : i32
    %c0_i32_0 = arith.constant 0 : i32
    %c0_i32_1 = arith.constant 0 : i32
    return %c0_i32, %c0_i32_0 : i32, i32
  }
  func.func @transform_5(%arg0: i32, %arg1: i32) -> (i32, i32) {
    %c0_i32 = arith.constant 0 : i32
    %c0_i32_0 = arith.constant 0 : i32
    %c0_i32_1 = arith.constant 0 : i32
    return %c0_i32, %c0_i32_0 : i32, i32
  }
  func.func @transform_6(%arg0: i32, %arg1: i32) -> (i32, i32) {
    %c0_i32 = arith.constant 0 : i32
    %c0_i32_0 = arith.constant 0 : i32
    %c0_i32_1 = arith.constant 0 : i32
    return %c0_i32, %c0_i32_0 : i32, i32
  }
  func.func @transform_7(%arg0: i32, %arg1: i32) -> (i32, i32) {
    %c0_i32 = arith.constant 0 : i32
    %c0_i32_0 = arith.constant 0 : i32
    %c0_i32_1 = arith.constant 0 : i32
    return %c0_i32, %c0_i32_0 : i32, i32
  }
  func.func @transform_8(%arg0: i32, %arg1: i32) -> (i32, i32, i32) {
    %c0_i32 = arith.constant 0 : i32
    %c0_i32_0 = arith.constant 0 : i32
    return %arg0, %c0_i32, %arg1 : i32, i32, i32
  }
  func.func @transform_9(%arg0: i32, %arg1: i32) -> (i32, i32, i32) {
    %c0_i32 = arith.constant 0 : i32
    %c0_i32_0 = arith.constant 0 : i32
    return %arg0, %arg1, %c0_i32 : i32, i32, i32
  }
}

</mosaic_0001>

<bundles_post_ra>
// kernel: tpu_custom_call.1
= control target key start
LH: loop header
LB: loop body
LE: loop exit
PB: predicated region body
PF: predicated region fallthrough
CT: control target
= control target key end

     0   :  { %s3311_s0 = inlined_call_operand.vmem [shape: f32[2,32,256], index: 0, kind: input, shape index: {}]   ;;  %s3312_s1 = inlined_call_operand.hbm [shape: f32[2,32,256], index: 1, kind: input, shape index: {}]   ;;  %s3313_s2 = inlined_call_operand.vmem [shape: bf16[32,128], index: 2, kind: input, shape index: {}]   ;;  %s3314_s3 = inlined_call_operand.vmem [shape: f32[1,128], index: 3, kind: input, shape index: {}]   ;;  %s3315_s4 = inlined_call_operand.vmem [shape: bf16[128,32], index: 4, kind: input, shape index: {}]   ;;  %s3316_s5 = inlined_call_operand.vmem [shape: f32[128,1], index: 5, kind: input, shape index: {}]   ;;  %s3317_s6 = inlined_call_operand.vmem [shape: bf16[32,32], index: 6, kind: input, shape index: {}]   ;;  %s3318_s7 = inlined_call_operand.vmem [shape: f32[32,1], index: 7, kind: input, shape index: {}]   ;;  %s3319_s8 = inlined_call_operand.hbm [shape: f32[2,32,256], index: 8, kind: output, shape index: {0}]   ;;  %s3320_s9 = inlined_call_operand.hbm [shape: f32[2,256,256], index: 9, kind: output, shape index: {1}]  }
   0x1   :  { %3329 = sst [smem:[#allocation15_spill]] %s3311_s0 }
   0x2   :  { %3330 = sst [smem:[#allocation16_spill]] %s3314_s3 }
   0x3   :  { %3331 = sst [smem:[#allocation17_spill]] %s3319_s8 }
   0x4   :  { %3332 = sst [smem:[#allocation18_spill]] %s3320_s9 }
   0x5   :  { %15 = vsyncpa [#allocation3], 0 }
   0x6   :  { %17 = vsyncpa [#allocation3 + $0x1], 0 }
   0x7   :  { %18 = vsyncpa [#allocation4], 0 }
   0x8   :  { %20 = vsyncpa [#allocation4 + $0x1], 0 }
   0x9   :  { %21 = vsyncpa [#allocation7], 0 }
   0xa   :  { %23 = vsyncpa [#allocation7 + $0x1], 0  ;;  %s2477_s30 = smov 0   ;;  %s2479_s10 = smov 0  }
   0xb   :  { %s2481_s11 = smov 0   ;;  %s2483_s12 = smov 0  }
   0xc   :  { %s2485_s13 = smov 0   ;;  %s2487_s14 = smov 0  }
   0xd   :  { %s2489_s15 = smov 0   ;;  %s2491_s16 = smov 0  }
   0xe LB: > { %3333 = sst [smem:[#allocation11_spill]] %s2386_s30  ;;  %s1806_s17 = sadd.s32 4294967295, %s2414_s16   ;;  %s2414_s16 = sphi %s2491_s16, %s29_s16   ;;  %s2410_s15 = sphi %s2489_s15, %s3360_s15   ;;  %s2406_s14 = sphi %s2487_s14, %s3359_s14   ;;  %s2402_s13 = sphi %s2485_s13, %s3358_s13   ;;  %s2398_s12 = sphi %s2483_s12, %s3357_s12   ;;  %s2394_s11 = sphi %s2481_s11, %s3356_s11   ;;  %s2390_s10 = sphi %s2479_s10, %s3355_s10   ;;  %s2386_s30 = sphi %s2477_s30, %s3354_s30  }
   0xf   : > { %3334 = sst [smem:[#allocation12_spill]] %s2398_s12  ;;  %s1807_s18 = sadd.s32 4294967294, %s2414_s16  }
  0x10   : > { %s38_s19 = sadd.s32 1, %s2406_s14  ;;  %s41_s20 = sadd.s32 1, %s2410_s15 }
  0x11   : > { %p39_p0 = scmp.ge.s32.totalorder %s38_s19, 2  ;;  %s76_s21 = sadd.s32 1, %s2394_s11 }
  0x12   : > { %p83_p1 = scmp.ne.s32.totalorder %s2394_s11, %s2390_s10  ;;  %p84_p2 = scmp.eq.s32.totalorder %s2414_s16, 0 }
  0x13   : > { %s3362_s19 = smov (%p39_p0, %s38_s19), 0  ;;  %s3364_s20 = smov (!%p39_p0, %s41_s20), %s2410_s15 }
  0x14   : > { %3335 = sst [smem:[#allocation13_spill]] %s3362_s19  ;;  %s72_s22 = ssub.s32 %s2406_s14, %s3362_s19 }
  0x15   : > { %p2530_p3 = por %p84_p2, %p83_p1  ;;  %p43_p4 = scmp.ge.s32.totalorder %s3364_s20, 2 }
  0x16   : > { %p89_p5 = scmp.ne.s32.totalorder %s2390_s10, %s2386_s30  ;;  %p90_p6 = scmp.eq.s32.totalorder %s1806_s17, 0 }
  0x17   : > { %p241_p7 = scmp.eq.s32.totalorder %s1806_s17, 3  ;;  %s3366_s20 = smov (%p43_p4, %s3364_s20), 0 }
  0x18   : > { %3337 = sst [smem:[#allocation14_spill]] %s3366_s20  ;;  %p2538_p8 = por %p90_p6, %p89_p5 }
  0x19   : > { %p2542_p9 = por %p241_p7, %p83_p1  ;;  %s71_s26 = ssub.s32 %s2410_s15, %s3366_s20 }
  0x1a   : > { %p247_p10 = scmp.eq.s32.totalorder %s1807_s18, 3  ;;  %s73_s27 = sor.u32 %s72_s22, %s71_s26 }
  0x1b   : > { %s3339_s25 = scalar_select %p2542_p9, 1, 0 }
  0x1c   : > { %p74_p11 = scmp.eq.s32.totalorder %s73_s27, 0  ;;  %p2548_p12 = por %p247_p10, %p89_p5 }
  0x1d   : > { %p1977_p13 = scmp.lt.s32.totalorder %s2414_s16, 4  ;;  %s321_s29 = sand.u32 1, %s2394_s11  }
  0x1e   : > { %s3340_s28 = scalar_select %p2548_p12, 1, 0 }
  0x1f   : > { %s2555_s17 = scalar_select %p74_p11, %s2394_s11, %s76_s21  }
  0x20   : > { %s1810_s19 = sshll.u32 %s321_s29, 5  ;;  %s1811_s30 = sshll.u32 %s2410_s15, 3 }
  0x21   : > { %s330_s8 = sadd.s32 %s2406_s14, %s1811_s30  ;;  %s325_s9 = scalar_lea.vmem [#allocation2], %s1810_s19 }
  0x22   : > { %s333_s12 = sshll.u32 %s325_s9, 4  ;;  %s1812_s3 = sshll.u32 %s330_s8, 7  ;;  %s2559_s12 = int_to_ptr.vmem [resolvable:$true] %s333_s12 }
  0x23   : > { %s2564_s22 = scalar_lea.hbm %s3312_s1, %s1812_s3  ;;  %p2568_p0 = pnand %p1977_p13, %p2530_p3 }
  0x24   : > { %s2572_s9 = scalar_lea.sflag [#allocation3], %s321_s29  ;;  %s2254_s8 = scalar_lea.hbm %s2564_s22, 512 }
  0x25   : > { %p2255_p1 = scmp.ne.s32.totalorder %s2564_s22, %s2254_s8  ;;  %p2256_p2 = pneg %p2568_p0 }
  0x26   : > { %s2259_s19 = scalar_lea.hbm %s3312_s1, 2048  ;;  %p2260_p3 = scmp.lt.u32.totalorder %s2564_s22, %s3312_s1 }
  0x27   : > { %p2257_p4 = pnand %p2256_p2, %p2255_p1  ;;  %p2261_p6 = scmp.lt.u32.totalorder %s2259_s19, %s2254_s8 }
  0x28   : > { %p2263_p10 = scmp.lt.u32.totalorder %s2254_s8, %s2564_s22 }
  0x29   : > { %p2258_p5 = pneg %p2257_p4  ;;  %p2262_p7 = por %p2261_p6, %p2260_p3 }
  0x2b   : > { %p2264_p11 = por %p2263_p10, %p2262_p7 }
  0x2d   : > { %p2265_p13 = pnand %p2264_p11, %p2258_p5 }
  0x2f   : > { %2268 = shalt.err (!%p2265_p13)
}
  0x30   : > { %s2269_s26 = scalar_lea.vmem %s2559_s12, 512  ;;  %s2416_s27 = smov [#allocation2]  }
  0x31   : > { %p2270_p1 = scmp.ne.s32.totalorder %s2559_s12, %s2269_s26  ;;  %s2274_s29 = sshll.u32 %s2416_s27, 4  ;;  %s2275_s29 = int_to_ptr.vmem [resolvable:$false] %s2274_s29 }
  0x32   : > { %s2276_s18 = scalar_lea.vmem %s2275_s29, 1024  ;;  %p2277_p9 = scmp.lt.s32.totalorder %s2559_s12, %s2275_s29 }
  0x33   : > { %p2272_p4 = pnand %p2270_p1, %p2256_p2  ;;  %p2278_p3 = scmp.lt.s32.totalorder %s2276_s18, %s2269_s26 }
  0x35   : > { %p2273_p12 = pneg %p2272_p4  ;;  %p2279_p6 = por %p2278_p3, %p2277_p9 }
  0x37   : > { %p2280_p7 = pnand %p2279_p6, %p2273_p12 }
  0x39   : > { %2283 = shalt.err (!%p2280_p7)
}
  0x3a   : > { %s2417_s8 = smov 256   ;;  %s2418_s3 = smov 128  }
  0x3b   : > { %s2419_s30 = smov 8   ;;  %p1813_p2 = scmp.ge.s32.totalorder %s2414_s16, 1 }
  0x3c   : > { %1969 = dma.hbm_to_vmem [thread:$0]  (!%p2568_p0), %s2564_s22, 512, %s2559_s12, %s2572_s9, %s2417_s8, %s2418_s3, %s2419_s30  }
  0x3d   : > { %p341_p5 = scmp.lt.s32.totalorder %s2414_s16, 5 }
  0x3f   : > { %p342_p10 = pnand %p1813_p2, %p341_p5 }
  0x40   : > { %s2603_s19 = sand.u32 (!%p342_p10), 1, %s2390_s10  }
  0x41   : > { %345 = sbr.rel (%p342_p10) target bundleno = 1459 (0x5b3), region = 52  ;;  %s3328_s20 = sshll.u32 (!%p342_p10), %s2603_s19, 5 }
  0x42   : > { %s348_s23 = scalar_lea.sflag (!%p342_p10), [#allocation3], %s2603_s19  ;;  %s2609_s26 = scalar_lea.vmem (!%p342_p10), [#allocation2], %s3328_s20 }
  0x48   : > { %2373 = dma.done.wait (%p2538_p8), %s348_s23, 512  }
  0x49   : > { %2375 = vsyncadd (%p2538_p8), %s348_s23, 4294966784  ;;  %p396_p9 = scmp.lt.s32.totalorder %s2402_s13, 1  ;;  %v2420_v0 = vmov 0   ;;  %s3342_s0 = sld [smem:[#allocation15_spill]]  ;;  %v882_v1 = vld [vmem:[%s2609_s26] sm:$0xff]  ;;  %v883_v2 = vld [vmem:[%s2609_s26 + $0x8] sm:$0xff] }
  0x4a   : > { %624 = vmatprep.mubr.bf16.mxu0 %v2420_v0  ;;  %694 = vmatprep.mubr.bf16.mxu1 %v2420_v0  ;;  %v884_v15 = vld [vmem:[%s2609_s26 + $0x10] sm:$0xff]  ;;  %v2142_v16 = vld [vmem:[%s3315_s4] sm:$0xff]   ;;  %v885_v17 = vld [vmem:[%s2609_s26 + $0x18] sm:$0xff]  ;;  %vm567_vm0 = vcmask 261120   ;;  %s3343_s24 = sld [smem:[#allocation16_spill]]  ;;  %s3344_s21 = sld [smem:[#allocation12_spill]] }
  0x4b   : > { %s397_s12 = scalar_select %p396_p9, %s2402_s13, 1  ;;  %2052 = vset.pattern.permute.xlu1 %v2420_v0  ;;  %886 = vxpose.xlu0.b32.start [1/4] (short) %v882_v1, 128  ;;  %v2148_v18 = vld [vmem:[%s3315_s4 + $0x38] sm:$0xff]   ;;  %v431_v19 = vld [vmem:[%s3316_s5] sm:$0xff]  ;;  %v2143_v20 = vld [vmem:[%s3315_s4 + $0x8] sm:$0xff]  }
  0x4c   : > { %449 = vperm.xlu1 %2052, %v431_v19   ;;  %v432_v21 = vld [vmem:[%s3316_s5 + $0x8] sm:$0xff]  ;;  %v2151_v22 = vld [vmem:[%s3313_s2] sm:$0xff]   ;;  %v433_v24 = vld [vmem:[%s3316_s5 + $0x10] sm:$0xff]  ;;  %s3345_s30 = sld [smem:[#allocation18_spill]]  ;;  %s1638_s20 = scalar_lea.sflag [#allocation7], %s2603_s19 }
  0x4d   : > { %s1860_s22 = sshll.u32 %s397_s12, 6  ;;  %v2150_v23 = vld [vmem:[%s3317_s6] sm:$0xff]   ;;  %v2153_v25 = vld [vmem:[%s3313_s2 + $0x8] sm:$0xff]   ;;  %v434_v26 = vld [vmem:[%s3316_s5 + $0x18] sm:$0xff]  ;;  %s1816_s12 = sshll.u32 %s2603_s19, 8 }
  0x4e   : > { %v2144_v27 = vld [vmem:[%s3315_s4 + $0x10] sm:$0xff]   ;;  %v2152_v28 = vld [vmem:[%s3317_s6 + $0x8] sm:$0xff]   ;;  %v2145_v31 = vld [vmem:[%s3315_s4 + $0x18] sm:$0xff]   ;;  %p3347_p12 = scmp.ne.s32.totalorder %s3339_s25, 0 }
  0x4f   : > { %s400_s27 = scalar_lea.vmem %s3342_s0, %s1860_s22  ;;  %887 = vxpose.xlu0.b32.cont [2/4] (short) %v883_v2, 128  ;;  %v436_v29 = vld [vmem:[%s3316_s5 + $0x28] sm:$0xff]  ;;  %v437_v30 = vld [vmem:[%s3316_s5 + $0x30] sm:$0xff]  ;;  %v438_v32 = vld [vmem:[%s3316_s5 + $0x38] sm:$0xff]  ;;  %s3084_s22 = scalar_lea.vmem [#allocation6], %s1816_s12 }
  0x50   : > { %v404_v3 = vld [vmem:[%s400_s27 + $0x8] sm:$0xff]  ;;  %v406_v4 = vld [vmem:[%s400_s27 + $0x18] sm:$0xff]  ;;  %v403_v6 = vld [vmem:[%s400_s27] sm:$0xff]  ;;  %454 = vperm.xlu1 %2052, %v432_v21   ;;  %s1861_s9 = sshll.u32 %s3344_s21, 5 }
  0x51   : > { %v412_v5 = vpack.c.bf16 %v406_v4, %v404_v3  ;;  %v405_v7 = vld [vmem:[%s400_s27 + $0x10] sm:$0xff]  ;;  %v408_v8 = vld [vmem:[%s400_s27 + $0x28] sm:$0xff]  ;;  %v410_v10 = vld [vmem:[%s400_s27 + $0x38] sm:$0xff] }
  0x52   : > { %v411_v9 = vpack.c.bf16 %v405_v7, %v403_v6  ;;  %v407_v11 = vld [vmem:[%s400_s27 + $0x20] sm:$0xff]  ;;  %v409_v12 = vld [vmem:[%s400_s27 + $0x30] sm:$0xff]  ;;  %v414_v13 = vpack.c.bf16 %v410_v10, %v408_v8  ;;  %v440_v35 = vld [vmem:[%s3316_s5 + $0x48] sm:$0xff]  ;;  %s1856_s27 = sshll.u32 %s2402_s13, 6  ;;  %s3346_s23 = smov %s3345_s30 }
  0x53   : > { %592 = vmatprep.subr.bf16.mxu0 %v412_v5  ;;  %1956 = vmatprep.subr.bf16.mxu1 %v412_v5  ;;  %v413_v14 = vpack.c.bf16 %v409_v12, %v407_v11  ;;  %v439_v33 = vld [vmem:[%s3316_s5 + $0x40] sm:$0xff]  ;;  %v441_v36 = vld [vmem:[%s3316_s5 + $0x50] sm:$0xff]  ;;  %v2147_v37 = vld [vmem:[%s3315_s4 + $0x28] sm:$0xff]   ;;  %s1668_s29 = sadd.s32 %s1861_s9, %s1856_s27  ;;  %s2421_s9 = smov [#allocation6]  }
  0x54   : > { %593 = vmatpush1.bf16.msra.mxu0 %v411_v9  ;;  %1958 = vmatpush1.bf16.msra.mxu1 %v411_v9  ;;  %v2146_v34 = vld [vmem:[%s3315_s4 + $0x20] sm:$0xff]   ;;  %v442_v38 = vld [vmem:[%s3316_s5 + $0x58] sm:$0xff]  ;;  %v2149_v40 = vld [vmem:[%s3315_s4 + $0x30] sm:$0xff]   ;;  %s1857_s18 = sshll.u32 %s1668_s29, 7  ;;  %s2288_s27 = sshll.u32 %s2421_s9, 4  ;;  %s2289_s27 = int_to_ptr.vmem [resolvable:$false] %s2288_s27 }
  0x55   : > { %594 = vmatprep.subr.bf16.mxu0 %v414_v13  ;;  %1957 = vmatprep.subr.bf16.mxu1 %v414_v13  ;;  %v443_v39 = vld [vmem:[%s3316_s5 + $0x60] sm:$0xff]  ;;  %v444_v41 = vld [vmem:[%s3316_s5 + $0x68] sm:$0xff]  ;;  %v445_v42 = vld [vmem:[%s3316_s5 + $0x70] sm:$0xff]  ;;  %s3215_s12 = scalar_lea.hbm %s3345_s30, %s1857_s18  ;;  %s2290_s0 = scalar_lea.vmem %s2289_s27, 8192 }
  0x56   : > { %888 = vxpose.xlu0.b32.cont [3/4] (short) %v884_v15, 128  ;;  %459 = vperm.xlu1 %2052, %v433_v24   ;;  %v446_v43 = vld [vmem:[%s3316_s5 + $0x78] sm:$0xff]  ;;  %v709_v44 = vld [vmem:[%s3318_s7] sm:$0xff] }
  0x57   : > { %v435_v45 = vld [vmem:[%s3316_s5 + $0x20] sm:$0xff] }
  0x58   : > { %595 = vmatpush1.bf16.msra.mxu0 %v413_v14  ;;  %1959 = vmatpush1.bf16.msra.mxu1 %v413_v14 }
  0x59   : > { %749 = vmatprep.subr.bf16.mxu1 %v412_v5 }
  0x5a   : > { %889 = vxpose.xlu0.b32.end [4/4] (short) %v885_v17, 128  ;;  %464 = vperm.xlu1 %2052, %v434_v26  }
  0x5b   : > { %1827 = vmatmul.mubr.msk.bf16.vlgmr.msra.gmra.mrb[0].mxu0 %vm567_vm0, %v2142_v16  ;;  %1834 = vmatmul.mubr.msk.bf16.vlgmr.msra.gmra.mrb[0].mxu1 %vm567_vm0, %v2148_v18 }
  0x5c   : > { %634 = vmatprep.mubr.bf16.mxu0 %v2420_v0  ;;  %750 = vmatpush1.bf16.msra.mxu1 %v411_v9 }
  0x5d   : > { %781 = vmatprep.mubr.bf16.mxu1 %v2420_v0  ;;  %751 = vmatprep.subr.bf16.mxu1 %v414_v13 }
  0x5e   : > { %474 = vperm.xlu1 %2052, %v436_v29  }
  0x60   : > { %752 = vmatpush1.bf16.msra.mxu1 %v413_v14 }
  0x61   : > { %1936 = vmatprep.subr.bf16.mxu1 %v2151_v22 }
  0x62   : > { %479 = vperm.xlu1 %2052, %v437_v30  }
  0x63   : > { %1828 = vmatmul.mubr.msk.bf16.gmra.mrb[4].mxu0 %vm567_vm0, %v2143_v20  ;;  %1837 = vmatmul.mubr.msk.bf16.vlgmr.msra.gmra.mrb[4].mxu1 %vm567_vm0, %v2150_v23 }
  0x64   : > { %644 = vmatprep.mubr.bf16.mxu0 %v2420_v0  ;;  %791 = vmatprep.mubr.bf16.mxu1 %v2420_v0 }
  0x65   : > { %1937 = vmatpush3.bf16.msra.mxu1 %v2151_v22 }
  0x66   : > { %1938 = vmatprep.subr.bf16.mxu1 %v2153_v25  ;;  %484 = vperm.xlu1 %2052, %v438_v32  }
  0x69   : > { %1939 = vmatpush3.bf16.msra.mxu1 %v2153_v25 }
  0x6a   : > { %489 = vperm.xlu1 %2052, %v439_v33  }
  0x6b   : > { %1829 = vmatmul.mubr.msk.bf16.gmra.mrb[8].mxu0 %vm567_vm0, %v2144_v27  ;;  %1838 = vmatmul.mubr.msk.bf16.gmra.mrb[8].mxu1 %vm567_vm0, %v2152_v28 }
  0x6c   : > { %654 = vmatprep.mubr.bf16.mxu0 %v2420_v0 }
  0x6e   : > { %494 = vperm.xlu1 %2052, %v440_v35  }
  0x72   : > { %499 = vperm.xlu1 %2052, %v441_v36  }
  0x73   : > { %1830 = vmatmul.mubr.msk.bf16.gmra.mrb[12].mxu0 %vm567_vm0, %v2145_v31 }
  0x74   : > { %664 = vmatprep.mubr.bf16.mxu0 %v2420_v0 }
  0x76   : > { %504 = vperm.xlu1 %2052, %v442_v38  }
  0x7a   : > { %509 = vperm.xlu1 %2052, %v443_v39  }
  0x7b   : > { %1831 = vmatmul.mubr.msk.bf16.gmra.mrb[16].mxu0 %vm567_vm0, %v2146_v34 }
  0x7c   : > { %674 = vmatprep.mubr.bf16.mxu0 %v2420_v0 }
  0x7e   : > { %514 = vperm.xlu1 %2052, %v444_v41  }
  0x82   : > { %519 = vperm.xlu1 %2052, %v445_v42  }
  0x83   : > { %1832 = vmatmul.mubr.msk.bf16.gmra.mrb[20].mxu0 %vm567_vm0, %v2147_v37  ;;  %2053 = vset.pattern.permute.xlu0 %v2420_v0 }
  0x84   : > { %684 = vmatprep.mubr.bf16.mxu0 %v2420_v0 }
  0x86   : > { %524 = vperm.xlu1 %2052, %v446_v43  }
  0x8a   : > { %715 = vperm.xlu1 %2052, %v709_v44  }
  0x8b   : > { %1833 = vmatmul.mubr.msk.bf16.gmra.mrb[24].mxu0 %vm567_vm0, %v2149_v40 }
  0xb3   : > { %469 = vperm.xlu0 %2053, %v435_v45  }
  0xcb   : > { %v450_v51 = vpop.permute.xlu1 %449 }
  0xce   : > { %v902_v46 = vpop.trf.xlu0 }
  0xcf   : > { %v455_v54 = vpop.permute.xlu1 %454 }
  0xd2   : > { %v903_v47 = vpop.trf.xlu0 }
  0xd3   : > { %v918_v48 = vpack.c.bf16 %v903_v47, %v902_v46 }
  0xd5   : > { %1940 = vmatprep.mubr.msk.bf16.mxu1 %vm567_vm0, %v918_v48  ;;  %v460_v57 = vpop.permute.xlu1 %459 }
  0xd6   : > { %v904_v49 = vpop.trf.xlu0 }
  0xd9   : > { %v2736_v61 = vpop.permute.xlu1 %464 }
  0xda   : > { %v905_v50 = vpop.trf.xlu0 }
  0xdb   : > { %v919_v52 = vpack.c.bf16 %v905_v50, %v904_v49 }
  0xdd   : > { %1941 = vmatmul.mubr.msk.bf16.vlgmr.msra.gmra.mrb[12].mxu1 %vm567_vm0, %v919_v52  ;;  %v2739_v63 = vpop.permute.xlu1 %474 }
  0xde   : > { %v906_v53 = vpop.trf.xlu0 }
  0xe1   : > { %v2742_v4 = vpop.permute.xlu1 %479 }
  0xe2   : > { %v907_v55 = vpop.trf.xlu0 }
  0xe3   : > { %v920_v56 = vpack.c.bf16 %v907_v55, %v906_v53 }
  0xe5   : > { %1944 = vmatprep.mubr.msk.bf16.mxu1 %vm567_vm0, %v920_v56  ;;  %v2745_v7 = vpop.permute.xlu1 %484 }
  0xe6   : > { %v908_v58 = vpop.trf.xlu0 }
  0xe9   : > { %v2747_v11 = vpop.permute.xlu1 %489 }
  0xea   : > { %v909_v59 = vpop.trf.xlu0 }
  0xeb   : > { %v921_v60 = vpack.c.bf16 %v909_v59, %v908_v58 }
  0xed   : > { %1945 = vmatmul.mubr.msk.bf16.gmra.mrb[16].mxu1 %vm567_vm0, %v921_v60  ;;  %v2750_v13 = vpop.permute.xlu1 %494 }
  0xee   : > { %v910_v62 = vpop.trf.xlu0 }
  0xf1   : > { %v2754_v16 = vpop.permute.xlu1 %499 }
  0xf2   : > { %v911_v1 = vpop.trf.xlu0 }
  0xf3   : > { %v922_v2 = vpack.c.bf16 %v911_v1, %v910_v62 }
  0xf5   : > { %1948 = vmatprep.mubr.msk.bf16.mxu1 %vm567_vm0, %v922_v2  ;;  %v2756_v17 = vpop.permute.xlu1 %504 }
  0xf6   : > { %v912_v3 = vpop.trf.xlu0 }
  0xf9   : > { %v2758_v18 = vpop.permute.xlu1 %509 }
  0xfa   : > { %v913_v5 = vpop.trf.xlu0 }
  0xfb   : > { %v923_v6 = vpack.c.bf16 %v913_v5, %v912_v3 }
  0xfd   : > { %1949 = vmatmul.mubr.msk.bf16.gmra.mrb[20].mxu1 %vm567_vm0, %v923_v6  ;;  %v2760_v19 = vpop.permute.xlu1 %514 }
  0xfe   : > { %v914_v8 = vpop.trf.xlu0 }
 0x101   : > { %v520_v20 = vpop.permute.xlu1 %519 }
 0x102   : > { %v915_v9 = vpop.trf.xlu0 }
 0x103   : > { %v924_v10 = vpack.c.bf16 %v915_v9, %v914_v8 }
 0x105   : > { %1952 = vmatprep.mubr.msk.bf16.mxu1 %vm567_vm0, %v924_v10  ;;  %v525_v24 = vpop.permute.xlu1 %524 }
 0x106   : > { %v916_v12 = vpop.trf.xlu0 }
 0x109   : > { %v716_v43 = vpop.permute.xlu1 %715 }
 0x10a   : > { %v917_v14 = vpop.trf.xlu0 }
 0x10b   : > { %v925_v15 = vpack.c.bf16 %v917_v14, %v916_v12 }
 0x10d   : > { %1953 = vmatmul.mubr.msk.bf16.gmra.mrb[24].mxu1 %vm567_vm0, %v925_v15 }
 0x10e   : > { %1126 = vmatprep.mubr.bf16.mxu1 %v2420_v0 }
 0x12e   : > { %v626_v21 = vpop.f32.mrb[0].mxu0  ;;  %v696_v27 = vpop.f32.mrb[0].mxu1 }
 0x12f   : > { %v627_v22 = vadd.f32 %v626_v21, %v450_v51  ;;  %v628_v23 = vpop.f32.mrb[1].mxu0  ;;  %v2762_v30 = vadd.f32 %v696_v27, %v520_v20  ;;  %v698_v31 = vpop.f32.mrb[1].mxu1 }
 0x130   : > { %v629_v25 = vadd.f32 %v628_v23, %v450_v51  ;;  %v630_v26 = vpop.f32.mrb[2].mxu0  ;;  %v2764_v33 = vadd.f32 %v698_v31, %v520_v20  ;;  %v700_v34 = vpop.f32.mrb[2].mxu1 }
 0x131   : > { %v631_v28 = vadd.f32 %v630_v26, %v455_v54  ;;  %v632_v29 = vpop.f32.mrb[3].mxu0  ;;  %v2766_v36 = vadd.f32 %v700_v34, %v525_v24  ;;  %v702_v37 = vpop.f32.mrb[3].mxu1 }
 0x132   : > { %v633_v32 = vadd.f32 %v632_v29, %v455_v54  ;;  %v2768_v39 = vadd.f32 %v702_v37, %v525_v24  ;;  %v470_v60 = vpop.permute.xlu0 %469 }
 0x133   : > { %v1078_v35 = vpack.c.bf16 %v631_v28, %v627_v22  ;;  %v1092_v40 = vpack.c.bf16 %v2766_v36, %v2762_v30 }
 0x134   : > { %v1079_v38 = vpack.c.bf16 %v633_v32, %v629_v25  ;;  %v1093_v42 = vpack.c.bf16 %v2768_v39, %v2764_v33 }
 0x136   : > { %v636_v41 = vpop.f32.mrb[4].mxu0  ;;  %1094 = vmatprep.subr.bf16.mxu1 %v1079_v38  ;;  %v783_v48 = vpop.f32.mrb[4].mxu1 }
 0x137   : > { %v637_v44 = vadd.f32 %v636_v41, %v460_v57  ;;  %v638_v45 = vpop.f32.mrb[5].mxu0  ;;  %1095 = vmatpush1.bf16.msra.mxu1 %v1078_v35  ;;  %v2775_v51 = vadd.f32 %v783_v48, %v716_v43  ;;  %v785_v52 = vpop.f32.mrb[5].mxu1 }
 0x138   : > { %v639_v46 = vadd.f32 %v638_v45, %v460_v57  ;;  %v640_v47 = vpop.f32.mrb[6].mxu0  ;;  %v2778_v54 = vadd.f32 %v785_v52, %v716_v43  ;;  %v2780_v55 = vpop.f32.mrb[6].mxu1 }
 0x139   : > { %v641_v49 = vadd.f32 %v640_v47, %v2736_v61  ;;  %v642_v50 = vpop.f32.mrb[7].mxu0  ;;  %v2782_v58 = vpop.f32.mrb[7].mxu1 }
 0x13a   : > { %v643_v53 = vadd.f32 %v642_v50, %v2736_v61  ;;  %v2054_v57 = vpack.i.bf16 %v2775_v51, %v2778_v54 }
 0x13b   : > { %v1080_v56 = vpack.c.bf16 %v641_v49, %v637_v44 }
 0x13c   : > { %v1081_v59 = vpack.c.bf16 %v643_v53, %v639_v46 }
 0x13e   : > { %v646_v62 = vpop.f32.mrb[8].mxu0  ;;  %1096 = vmatprep.subr.bf16.mxu1 %v1081_v59  ;;  %v2786_v61 = vpop.f32.mrb[8].mxu1 }
 0x13f   : > { %v648_v1 = vpop.f32.mrb[9].mxu0  ;;  %v647_v2 = vadd.f32 %v646_v62, %v470_v60  ;;  %1097 = vmatpush1.bf16.msra.mxu1 %v1080_v56  ;;  %v2789_v9 = vpop.f32.mrb[9].mxu1 }
 0x140   : > { %v650_v3 = vpop.f32.mrb[10].mxu0  ;;  %v649_v5 = vadd.f32 %v648_v1, %v470_v60  ;;  %v2792_v12 = vpop.f32.mrb[10].mxu1 }
 0x141   : > { %v651_v6 = vadd.f32 %v650_v3, %v2739_v63  ;;  %v652_v8 = vpop.f32.mrb[11].mxu0  ;;  %v2794_v15 = vpop.f32.mrb[11].mxu1 }
 0x142   : > { %v653_v10 = vadd.f32 %v652_v8, %v2739_v63 }
 0x143   : > { %v1082_v14 = vpack.c.bf16 %v651_v6, %v647_v2 }
 0x144   : > { %v1083_v20 = vpack.c.bf16 %v653_v10, %v649_v5 }
 0x146   : > { %v656_v21 = vpop.f32.mrb[12].mxu0  ;;  %1098 = vmatprep.subr.bf16.mxu1 %v1083_v20 }
 0x147   : > { %v657_v22 = vadd.f32 %v656_v21, %v2742_v4  ;;  %v658_v23 = vpop.f32.mrb[13].mxu0  ;;  %1099 = vmatpush1.bf16.msra.mxu1 %v1082_v14 }
 0x148   : > { %v659_v24 = vadd.f32 %v658_v23, %v2742_v4  ;;  %v660_v25 = vpop.f32.mrb[14].mxu0 }
 0x149   : > { %v661_v26 = vadd.f32 %v660_v25, %v2745_v7  ;;  %v662_v27 = vpop.f32.mrb[15].mxu0 }
 0x14a   : > { %v663_v63 = vadd.f32 %v662_v27, %v2745_v7 }
 0x14b   : > { %v1084_v28 = vpack.c.bf16 %v661_v26, %v657_v22 }
 0x14c   : > { %v1085_v29 = vpack.c.bf16 %v663_v63, %v659_v24 }
 0x14e   : > { %v666_v31 = vpop.f32.mrb[16].mxu0  ;;  %1100 = vmatprep.subr.bf16.mxu1 %v1085_v29 }
 0x14f   : > { %v667_v32 = vadd.f32 %v666_v31, %v2747_v11  ;;  %v668_v34 = vpop.f32.mrb[17].mxu0  ;;  %1101 = vmatpush1.bf16.msra.mxu1 %v1084_v28 }
 0x150   : > { %v669_v35 = vadd.f32 %v668_v34, %v2747_v11  ;;  %v670_v37 = vpop.f32.mrb[18].mxu0 }
 0x151   : > { %v671_v38 = vadd.f32 %v670_v37, %v2750_v13  ;;  %v672_v4 = vpop.f32.mrb[19].mxu0 }
 0x152   : > { %v673_v41 = vadd.f32 %v672_v4, %v2750_v13 }
 0x153   : > { %v1086_v43 = vpack.c.bf16 %v671_v38, %v667_v32 }
 0x154   : > { %v1087_v44 = vpack.c.bf16 %v673_v41, %v669_v35 }
 0x156   : > { %v676_v45 = vpop.f32.mrb[20].mxu0  ;;  %1102 = vmatprep.subr.bf16.mxu1 %v1087_v44 }
 0x157   : > { %v677_v7 = vadd.f32 %v676_v45, %v2754_v16  ;;  %v678_v46 = vpop.f32.mrb[21].mxu0  ;;  %1103 = vmatpush1.bf16.msra.mxu1 %v1086_v43 }
 0x158   : > { %v679_v47 = vadd.f32 %v678_v46, %v2754_v16  ;;  %v680_v48 = vpop.f32.mrb[22].mxu0 }
 0x159   : > { %v681_v49 = vadd.f32 %v680_v48, %v2756_v17  ;;  %v682_v11 = vpop.f32.mrb[23].mxu0 }
 0x15a   : > { %v683_v50 = vadd.f32 %v682_v11, %v2756_v17 }
 0x15b   : > { %v1088_v52 = vpack.c.bf16 %v681_v49, %v677_v7 }
 0x15c   : > { %v1089_v53 = vpack.c.bf16 %v683_v50, %v679_v47 }
 0x15e   : > { %v686_v56 = vpop.f32.mrb[24].mxu0  ;;  %1104 = vmatprep.subr.bf16.mxu1 %v1089_v53 }
 0x15f   : > { %v687_v13 = vadd.f32 %v686_v56, %v2758_v18  ;;  %v688_v59 = vpop.f32.mrb[25].mxu0  ;;  %1105 = vmatpush1.bf16.msra.mxu1 %v1088_v52 }
 0x160   : > { %v689_v60 = vadd.f32 %v688_v59, %v2758_v18  ;;  %v690_v62 = vpop.f32.mrb[26].mxu0  ;;  %v1839_v18 = vld [vmem:[%s3343_s24] ss:$0 sm:$0xff]  ;;  %s1671_s24 = sshll.u32 %s3084_s22, 4  ;;  %s3210_s24 = int_to_ptr.vmem [resolvable:$true] %s1671_s24 }
 0x161   : > { %v691_v1 = vadd.f32 %v690_v62, %v2760_v19  ;;  %v692_v16 = vpop.f32.mrb[27].mxu0  ;;  %p2291_p13 = scmp.lt.s32.totalorder %s3210_s24, %s2289_s27 }
 0x162   : > { %v693_v2 = vadd.f32 %v692_v16, %v2760_v19 }
 0x163   : > { %v1090_v3 = vpack.c.bf16 %v691_v1, %v687_v13 }
 0x164   : > { %v1091_v5 = vpack.c.bf16 %v693_v2, %v689_v60 }
 0x166   : > { %1106 = vmatprep.subr.bf16.mxu1 %v1091_v5 }
 0x167   : > { %1107 = vmatpush1.bf16.msra.mxu1 %v1090_v3 }
 0x168   : > { %1108 = vmatprep.subr.bf16.mxu1 %v1093_v42 }
 0x16b   : > { %1109 = vmatpush1.bf16.msra.mxu1 %v1092_v40 }
 0x1b0   : > { %v1942_v17 = vpop.f32.mrb[12].mxu1 }
 0x1b1   : > { %v1007_v6 = vpop.f32.mrb[13].mxu1  ;;  %v1016_v19 = vadd.f32 %v1942_v17, %v1839_v18 }
 0x1b2   : > { %v1943_v8 = vpop.f32.mrb[14].mxu1  ;;  %v1008_v20 = vadd.f32 %v1839_v18, %v1007_v6 }
 0x1b3   : > { %v1019_v10 = vadd.f32 %v1943_v8, %v1839_v18  ;;  %v1010_v14 = vpop.f32.mrb[15].mxu1 }
 0x1b4   : > { %v1011_v21 = vadd.f32 %v1839_v18, %v1010_v14 }
 0x1b5   : > { %v1071_v22 = vpack.c.bf16 %v1019_v10, %v1016_v19 }
 0x1b6   : > { %v1070_v23 = vpack.c.bf16 %v1011_v21, %v1008_v20 }
 0x1b8   : > { %1127 = vmatmul.mubr.bf16.vlgmr.msra.gmra.mrb[28].mxu1 %v1070_v23  ;;  %v711_v23 = vld [vmem:[%s3318_s7 + $0x10] sm:$0xff] }
 0x1b9   : > { %1136 = vmatprep.mubr.bf16.mxu1 %v2420_v0 }
 0x1c0   : > { %v1946_v33 = vpop.f32.mrb[16].mxu1  ;;  %1137 = vmatmul.mubr.bf16.gmra.mrb[32].mxu1 %v1071_v22 }
 0x1c1   : > { %v1023_v30 = vpop.f32.mrb[17].mxu1  ;;  %1146 = vmatprep.mubr.bf16.mxu1 %v2420_v0  ;;  %v1032_v39 = vadd.f32 %v1946_v33, %v1839_v18 }
 0x1c2   : > { %v1947_v36 = vpop.f32.mrb[18].mxu1  ;;  %v1024_v24 = vadd.f32 %v1839_v18, %v1023_v30 }
 0x1c3   : > { %v1035_v40 = vadd.f32 %v1947_v36, %v1839_v18  ;;  %v1026_v42 = vpop.f32.mrb[19].mxu1 }
 0x1c4   : > { %v1027_v25 = vadd.f32 %v1839_v18, %v1026_v42 }
 0x1c5   : > { %v1073_v26 = vpack.c.bf16 %v1035_v40, %v1032_v39 }
 0x1c6   : > { %v1072_v27 = vpack.c.bf16 %v1027_v25, %v1024_v24  ;;  %v710_v24 = vld [vmem:[%s3318_s7 + $0x8] sm:$0xff] }
 0x1c8   : > { %1147 = vmatmul.mubr.bf16.gmra.mrb[36].mxu1 %v1072_v27 }
 0x1c9   : > { %1156 = vmatprep.mubr.bf16.mxu1 %v2420_v0 }
 0x1d0   : > { %1157 = vmatmul.mubr.bf16.gmra.mrb[40].mxu1 %v1073_v26  ;;  %v1950_v63 = vpop.f32.mrb[20].mxu1 }
 0x1d1   : > { %v1048_v28 = vadd.f32 %v1950_v63, %v1839_v18  ;;  %v1039_v29 = vpop.f32.mrb[21].mxu1  ;;  %1166 = vmatprep.mubr.bf16.mxu1 %v2420_v0 }
 0x1d2   : > { %v1040_v31 = vadd.f32 %v1839_v18, %v1039_v29  ;;  %v1951_v32 = vpop.f32.mrb[22].mxu1 }
 0x1d3   : > { %v1051_v34 = vadd.f32 %v1951_v32, %v1839_v18  ;;  %v1042_v35 = vpop.f32.mrb[23].mxu1 }
 0x1d4   : > { %v1043_v37 = vadd.f32 %v1839_v18, %v1042_v35 }
 0x1d5   : > { %v1075_v38 = vpack.c.bf16 %v1051_v34, %v1048_v28 }
 0x1d6   : > { %v1074_v4 = vpack.c.bf16 %v1043_v37, %v1040_v31 }
 0x1d8   : > { %1167 = vmatmul.mubr.bf16.gmra.mrb[44].mxu1 %v1074_v4 }
 0x1d9   : > { %1176 = vmatprep.mubr.bf16.mxu1 %v2420_v0 }
 0x1e0   : > { %v1954_v41 = vpop.f32.mrb[24].mxu1  ;;  %1177 = vmatmul.mubr.bf16.gmra.mrb[48].mxu1 %v1075_v38 }
 0x1e1   : > { %v1064_v43 = vadd.f32 %v1954_v41, %v1839_v18  ;;  %v1055_v44 = vpop.f32.mrb[25].mxu1  ;;  %1186 = vmatprep.mubr.bf16.mxu1 %v2420_v0 }
 0x1e2   : > { %v1056_v45 = vadd.f32 %v1839_v18, %v1055_v44  ;;  %v1955_v7 = vpop.f32.mrb[26].mxu1 }
 0x1e3   : > { %v1067_v46 = vadd.f32 %v1955_v7, %v1839_v18  ;;  %v1058_v47 = vpop.f32.mrb[27].mxu1 }
 0x1e4   : > { %v1059_v48 = vadd.f32 %v1839_v18, %v1058_v47 }
 0x1e5   : > { %v1077_v49 = vpack.c.bf16 %v1067_v46, %v1064_v43  ;;  %v712_v46 = vld [vmem:[%s3318_s7 + $0x18] sm:$0xff] }
 0x1e6   : > { %v1076_v11 = vpack.c.bf16 %v1059_v48, %v1056_v45 }
 0x1e8   : > { %1187 = vmatmul.mubr.bf16.gmra.mrb[52].mxu1 %v1076_v11 }
 0x1e9   : > { %1196 = vmatprep.mubr.bf16.mxu1 %v2420_v0 }
 0x1f0   : > { %1197 = vmatmul.mubr.bf16.gmra.mrb[56].mxu1 %v1077_v49 }
 0x28b   : > { %v2828_v50 = vpop.f32.mrb[28].mxu1 }
 0x28c   : > { %v2830_v52 = vpop.f32.mrb[29].mxu1 }
 0x28d   : > { %v2832_v53 = vpop.f32.mrb[30].mxu1  ;;  %v1207_v56 = vmax.f32 %v2828_v50, %v2830_v52 }
 0x28e   : > { %v2836_v13 = vpop.f32.mrb[31].mxu1 }
 0x28f   : > { %1208 = vmax.xlane.f32.xlu1 %v1207_v56  ;;  %v1210_v59 = vmax.f32 %v2832_v53, %v2836_v13 }
 0x293   : > { %1211 = vmax.xlane.f32.xlu1 %v1210_v59  ;;  %v2840_v60 = vpop.f32.mrb[32].mxu1 }
 0x294   : > { %v2842_v0 = vpop.f32.mrb[33].mxu1 }
 0x295   : > { %v2844_v62 = vpop.f32.mrb[34].mxu1  ;;  %v1213_v1 = vmax.f32 %v2840_v60, %v2842_v0 }
 0x296   : > { %v2848_v16 = vpop.f32.mrb[35].mxu1 }
 0x297   : > { %1214 = vmax.xlane.f32.xlu1 %v1213_v1  ;;  %v1216_v2 = vmax.f32 %v2844_v62, %v2848_v16 }
 0x29b   : > { %1217 = vmax.xlane.f32.xlu1 %v1216_v2  ;;  %v2852_v3 = vpop.f32.mrb[36].mxu1 }
 0x29c   : > { %v2854_v5 = vpop.f32.mrb[37].mxu1 }
 0x29d   : > { %v2856_v17 = vpop.f32.mrb[38].mxu1  ;;  %v1219_v18 = vmax.f32 %v2852_v3, %v2854_v5 }
 0x29e   : > { %v2860_v6 = vpop.f32.mrb[39].mxu1 }
 0x29f   : > { %1220 = vmax.xlane.f32.xlu0 %v1219_v18  ;;  %v1222_v8 = vmax.f32 %v2856_v17, %v2860_v6 }
 0x2a3   : > { %v2864_v19 = vpop.f32.mrb[40].mxu1 }
 0x2a4   : > { %v2866_v10 = vpop.f32.mrb[41].mxu1 }
 0x2a5   : > { %v2868_v14 = vpop.f32.mrb[42].mxu1  ;;  %v1225_v20 = vmax.f32 %v2864_v19, %v2866_v10 }
 0x2a6   : > { %v2872_v21 = vpop.f32.mrb[43].mxu1 }
 0x2a7   : > { %v1228_v22 = vmax.f32 %v2868_v14, %v2872_v21 }
 0x2ab   : > { %v2879_v33 = vpop.f32.mrb[44].mxu1 }
 0x2ac   : > { %725 = vperm.xlu1 %2052, %v711_v23   ;;  %v2881_v30 = vpop.f32.mrb[45].mxu1 }
 0x2ad   : > { %v2883_v36 = vpop.f32.mrb[46].mxu1  ;;  %v1231_v39 = vmax.f32 %v2879_v33, %v2881_v30 }
 0x2ae   : > { %v2887_v40 = vpop.f32.mrb[47].mxu1 }
 0x2af   : > { %v1234_v42 = vmax.f32 %v2883_v36, %v2887_v40 }
 0x2b3   : > { %v2894_v25 = vpop.f32.mrb[48].mxu1 }
 0x2b4   : > { %v2896_v26 = vpop.f32.mrb[49].mxu1 }
 0x2b5   : > { %720 = vperm.xlu0 %2053, %v710_v24   ;;  %v2898_v27 = vpop.f32.mrb[50].mxu1  ;;  %v1237_v63 = vmax.f32 %v2894_v25, %v2896_v26 }
 0x2b6   : > { %v2902_v28 = vpop.f32.mrb[51].mxu1 }
 0x2b7   : > { %v1240_v29 = vmax.f32 %v2898_v27, %v2902_v28 }
 0x2bb   : > { %v2906_v31 = vpop.f32.mrb[52].mxu1 }
 0x2bc   : > { %v2908_v32 = vpop.f32.mrb[53].mxu1 }
 0x2bd   : > { %v2910_v34 = vpop.f32.mrb[54].mxu1  ;;  %v1243_v35 = vmax.f32 %v2906_v31, %v2908_v32 }
 0x2be   : > { %v2914_v37 = vpop.f32.mrb[55].mxu1 }
 0x2bf   : > { %v1246_v38 = vmax.f32 %v2910_v34, %v2914_v37 }
 0x2c3   : > { %v2918_v4 = vpop.f32.mrb[56].mxu1 }
 0x2c4   : > { %v2920_v41 = vpop.f32.mrb[57].mxu1 }
 0x2c5   : > { %v1249_v43 = vmax.f32 %v2918_v4, %v2920_v41  ;;  %v2924_v44 = vpop.f32.mrb[58].mxu1 }
 0x2c6   : > { %v2926_v45 = vpop.f32.mrb[59].mxu1 }
 0x2c7   : > { %v1252_v7 = vmax.f32 %v2924_v44, %v2926_v45 }
 0x2d0   : > { %1223 = vmax.xlane.f32.xlu1 %v1222_v8 }
 0x2d4   : > { %1226 = vmax.xlane.f32.xlu1 %v1225_v20  ;;  %1241 = vmax.xlane.f32.xlu0 %v1240_v29 }
 0x2d8   : > { %1229 = vmax.xlane.f32.xlu1 %v1228_v22  ;;  %1244 = vmax.xlane.f32.xlu0 %v1243_v35 }
 0x2dc   : > { %1232 = vmax.xlane.f32.xlu1 %v1231_v39  ;;  %1250 = vmax.xlane.f32.xlu0 %v1249_v43 }
 0x2e0   : > { %1235 = vmax.xlane.f32.xlu1 %v1234_v42 }
 0x2f1   : > { %730 = vperm.xlu1 %2052, %v712_v46  }
 0x315   : > { %1238 = vmax.xlane.f32.xlu1 %v1237_v63 }
 0x319   : > { %1247 = vmax.xlane.f32.xlu1 %v1246_v38 }
 0x31c   : > { %v1209_v47 = vpop.xlane.xlu1 %1208 }
 0x31d   : > { %v1255_v48 = vsub.f32 %v2828_v50, %v1209_v47  ;;  %v1256_v49 = vsub.f32 %v2830_v52, %v1209_v47  ;;  %1253 = vmax.xlane.f32.xlu1 %v1252_v7 }
 0x31f   : > { %v1287_v11 = vmul.f32 1.442695, %v1255_v48  ;;  %v1289_v56 = vmul.f32 1.442695, %v1256_v49 }
 0x320   : > { %v1212_v59 = vpop.xlane.xlu1 %1211 }
 0x321   : > { %2154 = vpow2.f32 %v1287_v11  ;;  %v1257_v1 = vsub.f32 %v2832_v53, %v1212_v59  ;;  %v1258_v2 = vsub.f32 %v2836_v13, %v1212_v59 }
 0x322   : > { %2156 = vpow2.f32 %v1289_v56 }
 0x323   : > { %v1291_v18 = vmul.f32 1.442695, %v1257_v1  ;;  %v1293_v8 = vmul.f32 1.442695, %v1258_v2 }
 0x324   : > { %v1215_v20 = vpop.xlane.xlu1 %1214 }
 0x325   : > { %2158 = vpow2.f32 %v1291_v18  ;;  %v1259_v22 = vsub.f32 %v2840_v60, %v1215_v20  ;;  %v1260_v50 = vsub.f32 %v2842_v0, %v1215_v20 }
 0x326   : > { %2160 = vpow2.f32 %v1293_v8 }
 0x327   : > { %v1295_v52 = vmul.f32 1.442695, %v1259_v22  ;;  %v1297_v23 = vmul.f32 1.442695, %v1260_v50 }
 0x328   : > { %v1218_v39 = vpop.xlane.xlu1 %1217 }
 0x329   : > { %2162 = vpow2.f32 %v1295_v52  ;;  %v1261_v42 = vsub.f32 %v2844_v62, %v1218_v39  ;;  %v1262_v53 = vsub.f32 %v2848_v16, %v1218_v39 }
 0x32a   : > { %2164 = vpow2.f32 %v1297_v23 }
 0x32b   : > { %v2941_v13 = vpop.eup %2154  ;;  %v1299_v24 = vmul.f32 1.442695, %v1261_v42  ;;  %v1301_v63 = vmul.f32 1.442695, %v1262_v53 }
 0x32c   : > { %v2943_v29 = vpop.eup %2156  ;;  %v726_v35 = vpop.permute.xlu1 %725 }
 0x32d   : > { %v1221_v60 = vpop.xlane.xlu0 %1220  ;;  %2166 = vpow2.f32 %v1299_v24  ;;  %v2946_v0 = vadd.f32 %v2786_v61, %v726_v35  ;;  %v2949_v38 = vadd.f32 %v2789_v9, %v726_v35  ;;  %v1351_v43 = vadd.f32 %v2943_v29, %v2941_v13 }
 0x32e   : > { %v1263_v62 = vsub.f32 %v2852_v3, %v1221_v60  ;;  %2168 = vpow2.f32 %v1301_v63  ;;  %v1264_v16 = vsub.f32 %v2854_v5, %v1221_v60 }
 0x32f   : > { %v2955_v7 = vpop.eup %2158  ;;  %v2058_v46 = vpack.i.bf16 %v2946_v0, %v2949_v38  ;;  %1352 = vadd.xlane.f32.xlu0 %v1351_v43 }
 0x330   : > { %v1303_v47 = vmul.f32 1.442695, %v1263_v62  ;;  %v2959_v48 = vpop.eup %2160  ;;  %v1305_v61 = vmul.f32 1.442695, %v1264_v16 }
 0x331   : > { %v1354_v9 = vadd.f32 %v2959_v48, %v2955_v7 }
 0x332   : > { %2170 = vpow2.f32 %v1303_v47 }
 0x333   : > { %2172 = vpow2.f32 %v1305_v61  ;;  %v2963_v3 = vpop.eup %2162  ;;  %1355 = vadd.xlane.f32.xlu1 %v1354_v9 }
 0x334   : > { %v2965_v5 = vpop.eup %2164  ;;  %v721_v49 = vpop.permute.xlu0 %720 }
 0x335   : > { %v788_v11 = vadd.f32 %v2780_v55, %v721_v49  ;;  %v790_v56 = vadd.f32 %v2782_v58, %v721_v49  ;;  %v1357_v59 = vadd.f32 %v2965_v5, %v2963_v3 }
 0x337   : > { %v2971_v1 = vpop.eup %2166  ;;  %v2056_v2 = vpack.i.bf16 %v788_v11, %v790_v56  ;;  %1358 = vadd.xlane.f32.xlu0 %v1357_v59 }
 0x338   : > { %v2973_v18 = vpop.eup %2168 }
 0x339   : > { %v1360_v8 = vadd.f32 %v2973_v18, %v2971_v1 }
 0x33b   : > { %1361 = vadd.xlane.f32.xlu1 %v1360_v8 }
 0x33c   : > { %v2977_v20 = vpop.eup %2170 }
 0x33d   : > { %v2979_v22 = vpop.eup %2172 }
 0x33e   : > { %v1363_v55 = vadd.f32 %v2979_v22, %v2977_v20 }
 0x340   : > { %1364 = vadd.xlane.f32.xlu0 %v1363_v55 }
 0x35d   : > { %v1224_v58 = vpop.xlane.xlu1 %1223 }
 0x35e   : > { %v1265_v50 = vsub.f32 %v2856_v17, %v1224_v58  ;;  %v1266_v52 = vsub.f32 %v2860_v6, %v1224_v58 }
 0x360   : > { %v1307_v23 = vmul.f32 1.442695, %v1265_v50  ;;  %v1309_v39 = vmul.f32 1.442695, %v1266_v52 }
 0x361   : > { %v1227_v42 = vpop.xlane.xlu1 %1226 }
 0x362   : > { %2174 = vpow2.f32 %v1307_v23  ;;  %v1267_v53 = vsub.f32 %v2864_v19, %v1227_v42  ;;  %v1268_v24 = vsub.f32 %v2866_v10, %v1227_v42 }
 0x363   : > { %2176 = vpow2.f32 %v1309_v39 }
 0x364   : > { %v1311_v63 = vmul.f32 1.442695, %v1267_v53  ;;  %v1313_v35 = vmul.f32 1.442695, %v1268_v24 }
 0x365   : > { %v1230_v60 = vpop.xlane.xlu1 %1229 }
 0x366   : > { %2178 = vpow2.f32 %v1311_v63  ;;  %v1269_v62 = vsub.f32 %v2868_v14, %v1230_v60  ;;  %v1270_v16 = vsub.f32 %v2872_v21, %v1230_v60 }
 0x367   : > { %2180 = vpow2.f32 %v1313_v35 }
 0x368   : > { %v1315_v17 = vmul.f32 1.442695, %v1269_v62  ;;  %v1317_v6 = vmul.f32 1.442695, %v1270_v16 }
 0x369   : > { %v1233_v43 = vpop.xlane.xlu1 %1232 }
 0x36a   : > { %2182 = vpow2.f32 %v1315_v17  ;;  %v1271_v47 = vsub.f32 %v2879_v33, %v1233_v43  ;;  %v1272_v19 = vsub.f32 %v2881_v30, %v1233_v43 }
 0x36b   : > { %2184 = vpow2.f32 %v1317_v6 }
 0x36c   : > { %v2991_v10 = vpop.eup %2174  ;;  %v1319_v61 = vmul.f32 1.442695, %v1271_v47  ;;  %v1321_v9 = vmul.f32 1.442695, %v1272_v19 }
 0x36d   : > { %2055 = vxpose.xlu0.b32.start [1/4] (short) %v2054_v57, 128  ;;  %v2996_v14 = vpop.eup %2176  ;;  %v1236_v21 = vpop.xlane.xlu1 %1235 }
 0x36e   : > { %2186 = vpow2.f32 %v1319_v61  ;;  %v1273_v49 = vsub.f32 %v2883_v36, %v1236_v21  ;;  %v1274_v11 = vsub.f32 %v2887_v40, %v1236_v21  ;;  %v1366_v33 = vadd.f32 %v2996_v14, %v2991_v10 }
 0x36f   : > { %2188 = vpow2.f32 %v1321_v9 }
 0x370   : > { %v3002_v30 = vpop.eup %2178  ;;  %v1323_v56 = vmul.f32 1.442695, %v1273_v49  ;;  %v1325_v59 = vmul.f32 1.442695, %v1274_v11  ;;  %1367 = vadd.xlane.f32.xlu1 %v1366_v33 }
 0x371   : > { %2057 = vxpose.xlu0.b32.cont [2/4] (short) %v2056_v2, 128  ;;  %v3004_v51 = vpop.eup %2180  ;;  %v731_v54 = vpop.permute.xlu1 %730 }
 0x372   : > { %2190 = vpow2.f32 %v1323_v56  ;;  %v798_v57 = vadd.f32 %v2792_v12, %v731_v54  ;;  %v800_v36 = vadd.f32 %v2794_v15, %v731_v54  ;;  %v1369_v40 = vadd.f32 %v3004_v51, %v3002_v30 }
 0x373   : > { %2192 = vpow2.f32 %v1325_v59 }
 0x374   : > { %v3010_v8 = vpop.eup %2182  ;;  %v2060_v55 = vpack.i.bf16 %v798_v57, %v800_v36  ;;  %1370 = vadd.xlane.f32.xlu1 %v1369_v40 }
 0x375   : > { %2059 = vxpose.xlu0.b32.cont [3/4] (short) %v2058_v46, 128  ;;  %v3015_v2 = vpop.eup %2184  ;;  %v1242_v46 = vpop.xlane.xlu0 %1241 }
 0x376   : > { %v1372_v58 = vadd.f32 %v3015_v2, %v3010_v8  ;;  %v1277_v23 = vsub.f32 %v2898_v27, %v1242_v46  ;;  %v1278_v39 = vsub.f32 %v2902_v28, %v1242_v46 }
 0x378   : > { %v3019_v12 = vpop.eup %2186  ;;  %1373 = vadd.xlane.f32.xlu1 %v1372_v58  ;;  %v1331_v35 = vmul.f32 1.442695, %v1277_v23  ;;  %v1333_v17 = vmul.f32 1.442695, %v1278_v39 }
 0x379   : > { %2061 = vxpose.xlu0.b32.end [4/4] (short) %v2060_v55, 128  ;;  %v3021_v15 = vpop.eup %2188  ;;  %v1245_v42 = vpop.xlane.xlu0 %1244 }
 0x37a   : > { %v1375_v50 = vadd.f32 %v3021_v15, %v3019_v12  ;;  %v1279_v60 = vsub.f32 %v2906_v31, %v1245_v42  ;;  %v1280_v6 = vsub.f32 %v2908_v32, %v1245_v42 }
 0x37c   : > { %v3025_v52 = vpop.eup %2190  ;;  %1376 = vadd.xlane.f32.xlu1 %v1375_v50  ;;  %v1335_v27 = vmul.f32 1.442695, %v1279_v60  ;;  %v1337_v47 = vmul.f32 1.442695, %v1280_v6 }
 0x37d   : > { %v3027_v0 = vpop.eup %2192 }
 0x37e   : > { %v1378_v38 = vadd.f32 %v3027_v0, %v3025_v52 }
 0x380   : > { %1379 = vadd.xlane.f32.xlu1 %v1378_v38 }
 0x3a2   : > { %v1239_v53 = vpop.xlane.xlu1 %1238 }
 0x3a3   : > { %v1275_v24 = vsub.f32 %v2894_v25, %v1239_v53  ;;  %v1276_v63 = vsub.f32 %v2896_v26, %v1239_v53  ;;  %v1251_v25 = vpop.xlane.xlu0 %1250 }
 0x3a4   : > { %v1283_v31 = vsub.f32 %v2918_v4, %v1251_v25  ;;  %v1284_v61 = vsub.f32 %v2920_v41, %v1251_v25 }
 0x3a5   : > { %v1327_v62 = vmul.f32 1.442695, %v1275_v24  ;;  %v1329_v16 = vmul.f32 1.442695, %v1276_v63 }
 0x3a6   : > { %v1248_v43 = vpop.xlane.xlu1 %1247  ;;  %v1343_v49 = vmul.f32 1.442695, %v1283_v31  ;;  %v1345_v33 = vmul.f32 1.442695, %v1284_v61 }
 0x3a7   : > { %2194 = vpow2.f32 %v1327_v62  ;;  %v1281_v28 = vsub.f32 %v2910_v34, %v1248_v43  ;;  %v1282_v26 = vsub.f32 %v2914_v37, %v1248_v43 }
 0x3a8   : > { %2196 = vpow2.f32 %v1329_v16 }
 0x3a9   : > { %2198 = vpow2.f32 %v1331_v35  ;;  %v1339_v19 = vmul.f32 1.442695, %v1281_v28  ;;  %v1341_v32 = vmul.f32 1.442695, %v1282_v26 }
 0x3aa   : > { %2200 = vpow2.f32 %v1333_v17  ;;  %v1254_v9 = vpop.xlane.xlu1 %1253 }
 0x3ab   : > { %2202 = vpow2.f32 %v1335_v27  ;;  %v1285_v34 = vsub.f32 %v2924_v44, %v1254_v9  ;;  %v1286_v37 = vsub.f32 %v2926_v45, %v1254_v9 }
 0x3ac   : > { %2204 = vpow2.f32 %v1337_v47 }
 0x3ad   : > { %2206 = vpow2.f32 %v1339_v19  ;;  %v1347_v59 = vmul.f32 1.442695, %v1285_v34  ;;  %v1349_v54 = vmul.f32 1.442695, %v1286_v37 }
 0x3ae   : > { %2208 = vpow2.f32 %v1341_v32 }
 0x3af   : > { %2210 = vpow2.f32 %v1343_v49 }
 0x3b0   : > { %2212 = vpow2.f32 %v1345_v33 }
 0x3b1   : > { %v3041_v21 = vpop.eup %2194  ;;  %2214 = vpow2.f32 %v1347_v59 }
 0x3b2   : > { %v3044_v11 = vpop.eup %2196  ;;  %2216 = vpow2.f32 %v1349_v54 }
 0x3b3   : > { %v3047_v56 = vpop.eup %2198  ;;  %v1381_v4 = vadd.f32 %v3044_v11, %v3041_v21 }
 0x3b4   : > { %v3051_v41 = vpop.eup %2200 }
 0x3b5   : > { %1382 = vadd.xlane.f32.xlu1 %v1381_v4  ;;  %v3053_v57 = vpop.eup %2202  ;;  %v1384_v44 = vadd.f32 %v3051_v41, %v3047_v56 }
 0x3b6   : > { %v3057_v36 = vpop.eup %2204 }
 0x3b7   : > { %v3059_v45 = vpop.eup %2206  ;;  %v1387_v40 = vadd.f32 %v3057_v36, %v3053_v57 }
 0x3b8   : > { %v3063_v55 = vpop.eup %2208 }
 0x3b9   : > { %1385 = vadd.xlane.f32.xlu1 %v1384_v44  ;;  %v3065_v50 = vpop.eup %2210  ;;  %v1390_v38 = vadd.f32 %v3063_v55, %v3059_v45 }
 0x3ba   : > { %v3069_v46 = vpop.eup %2212 }
 0x3bb   : > { %v3071_v39 = vpop.eup %2214  ;;  %v1393_v42 = vadd.f32 %v3069_v46, %v3065_v50 }
 0x3bc   : > { %v1353_v58 = vpop.xlane.xlu0 %1352  ;;  %v3075_v53 = vpop.eup %2216 }
 0x3bd   : > { %1388 = vadd.xlane.f32.xlu1 %v1387_v40  ;;  %2218 = vrcp.f32 %v1353_v58  ;;  %v1396_v63 = vadd.f32 %v3075_v53, %v3071_v39 }
 0x3c0   : > { %v1356_v23 = vpop.xlane.xlu1 %1355 }
 0x3c1   : > { %2220 = vrcp.f32 %v1356_v23  ;;  %1391 = vadd.xlane.f32.xlu1 %v1390_v38 }
 0x3c4   : > { %v1359_v24 = vpop.xlane.xlu0 %1358 }
 0x3c5   : > { %2222 = vrcp.f32 %v1359_v24  ;;  %1394 = vadd.xlane.f32.xlu1 %v1393_v42 }
 0x3c7   : > { %v2219_v35 = vpop.eup %2218 }
 0x3c8   : > { %v1362_v60 = vpop.xlane.xlu1 %1361  ;;  %v3081_v62 = vmul.f32 %v2219_v35, %v2941_v13  ;;  %v1416_v16 = vmul.f32 %v2219_v35, %v2943_v29 }
 0x3c9   : > { %2224 = vrcp.f32 %v1362_v60  ;;  %1397 = vadd.xlane.f32.xlu1 %v1396_v63 }
 0x3ca   : > { %1600 = vst [vmem:[%s3084_s22] sm:$0xff] %v3081_v62  ;;  %1601 = vst [vmem:[%s3084_s22 + $0x8] sm:$0xff] %v1416_v16 }
 0x3cb   : > { %v2221_v17 = vpop.eup %2220 }
 0x3cc   : > { %v3090_v6 = vmul.f32 %v2221_v17, %v2955_v7  ;;  %v1418_v43 = vmul.f32 %v2221_v17, %v2959_v48 }
 0x3cd   : > { %v1365_v13 = vpop.xlane.xlu0 %1364 }
 0x3ce   : > { %2226 = vrcp.f32 %v1365_v13  ;;  %1602 = vst [vmem:[%s3084_s22 + $0x10] sm:$0xff] %v3090_v6  ;;  %v1448_v29 = vpack.c.bf16 %v1418_v43, %v1416_v16  ;;  %1603 = vst [vmem:[%s3084_s22 + $0x18] sm:$0xff] %v1418_v43  ;;  %v1447_v27 = vpack.c.bf16 %v3090_v6, %v3081_v62 }
 0x3cf   : > { %v2223_v28 = vpop.eup %2222 }
 0x3d0   : > { %1495 = vmatprep.mubr.bf16.mxu0 %v1448_v29  ;;  %v3099_v7 = vmul.f32 %v2223_v28, %v2965_v5  ;;  %v3102_v47 = vmul.f32 %v2223_v28, %v2963_v3 }
 0x3d2   : > { %1605 = vst [vmem:[%s3084_s22 + $0x28] sm:$0xff] %v3099_v7  ;;  %1604 = vst [vmem:[%s3084_s22 + $0x20] sm:$0xff] %v3102_v47 }
 0x3d3   : > { %v2225_v48 = vpop.eup %2224 }
 0x3d4   : > { %v3109_v25 = vmul.f32 %v2225_v48, %v2973_v18  ;;  %v3112_v26 = vmul.f32 %v2225_v48, %v2971_v1 }
 0x3d6   : > { %v1450_v31 = vpack.c.bf16 %v3109_v25, %v3099_v7  ;;  %1607 = vst [vmem:[%s3084_s22 + $0x38] sm:$0xff] %v3109_v25  ;;  %v1449_v3 = vpack.c.bf16 %v3112_v26, %v3102_v47  ;;  %1606 = vst [vmem:[%s3084_s22 + $0x30] sm:$0xff] %v3112_v26 }
 0x3d8   : > { %v2227_v5 = vpop.eup %2226 }
 0x3d9   : > { %v3123_v19 = vmul.f32 %v2227_v5, %v2979_v22  ;;  %v3126_v18 = vmul.f32 %v2227_v5, %v2977_v20 }
 0x3db   : > { %1609 = vst [vmem:[%s3084_s22 + $0x48] sm:$0xff] %v3123_v19  ;;  %1608 = vst [vmem:[%s3084_s22 + $0x40] sm:$0xff] %v3126_v18 }
 0x3ed   : > { %v2062_v1 = vpop.trf.xlu0 }
 0x3ee   : > { %v2066_v61 = vunpack.i.h.bf16 %v2062_v1  ;;  %v2063_v32 = vunpack.i.l.bf16 %v2062_v1 }
 0x3f1   : > { %v2067_v9 = vpop.trf.xlu0 }
 0x3f2   : > { %v2071_v49 = vunpack.i.h.bf16 %v2067_v9  ;;  %v2068_v34 = vunpack.i.l.bf16 %v2067_v9 }
 0x3f4   : > { %v874_v33 = vpack.c.bf16 %v2068_v34, %v2063_v32  ;;  %v866_v37 = vpack.c.bf16 %v2071_v49, %v2066_v61 }
 0x3f5   : > { %v2072_v4 = vpop.trf.xlu0 }
 0x3f6   : > { %1872 = vmatprep.subr.bf16.mxu0 %v874_v33  ;;  %v2076_v22 = vunpack.i.h.bf16 %v2072_v4  ;;  %v2073_v59 = vunpack.i.l.bf16 %v2072_v4 }
 0x3f7   : > { %1873 = vmatpush3.bf16.msra.mxu0 %v866_v37 }
 0x3f9   : > { %v2077_v54 = vpop.trf.xlu0 }
 0x3fa   : > { %v2081_v20 = vunpack.i.h.bf16 %v2077_v54  ;;  %v2078_v44 = vunpack.i.l.bf16 %v2077_v54 }
 0x3fc   : > { %v875_v40 = vpack.c.bf16 %v2078_v44, %v2073_v59  ;;  %v867_v58 = vpack.c.bf16 %v2081_v20, %v2076_v22 }
 0x3fd   : > { %v2082_v38 = vpop.trf.xlu0  ;;  %v1368_v23 = vpop.xlane.xlu1 %1367 }
 0x3fe   : > { %1874 = vmatprep.subr.bf16.mxu0 %v875_v40  ;;  %2228 = vrcp.f32 %v1368_v23  ;;  %v2086_v42 = vunpack.i.h.bf16 %v2082_v38  ;;  %v2083_v24 = vunpack.i.l.bf16 %v2082_v38 }
 0x3ff   : > { %1875 = vmatpush3.bf16.msra.mxu0 %v867_v58 }
 0x401   : > { %v2087_v63 = vpop.trf.xlu0  ;;  %v1371_v16 = vpop.xlane.xlu1 %1370 }
 0x402   : > { %v2091_v35 = vunpack.i.h.bf16 %v2087_v63  ;;  %v2088_v60 = vunpack.i.l.bf16 %v2087_v63  ;;  %2230 = vrcp.f32 %v1371_v16 }
 0x404   : > { %v876_v17 = vpack.c.bf16 %v2088_v60, %v2083_v24  ;;  %v868_v13 = vpack.c.bf16 %v2091_v35, %v2086_v42 }
 0x405   : > { %v2092_v43 = vpop.trf.xlu0  ;;  %v1374_v29 = vpop.xlane.xlu1 %1373 }
 0x406   : > { %1876 = vmatprep.subr.bf16.mxu0 %v876_v17  ;;  %2232 = vrcp.f32 %v1374_v29  ;;  %v2096_v48 = vunpack.i.h.bf16 %v2092_v43  ;;  %v2093_v5 = vunpack.i.l.bf16 %v2092_v43 }
 0x407   : > { %1877 = vmatpush3.bf16.msra.mxu0 %v868_v13 }
 0x408   : > { %v2229_v28 = vpop.eup %2228 }
 0x409   : > { %v2097_v1 = vpop.trf.xlu0  ;;  %v1377_v9 = vpop.xlane.xlu1 %1376  ;;  %v3133_v49 = vmul.f32 %v2229_v28, %v2996_v14  ;;  %v3136_v34 = vmul.f32 %v2229_v28, %v2991_v10 }
 0x40a   : > { %v2101_v61 = vunpack.i.h.bf16 %v2097_v1  ;;  %v2098_v32 = vunpack.i.l.bf16 %v2097_v1  ;;  %2234 = vrcp.f32 %v1377_v9 }
 0x40b   : > { %1611 = vst [vmem:[%s3084_s22 + $0x58] sm:$0xff] %v3133_v49  ;;  %1610 = vst [vmem:[%s3084_s22 + $0x50] sm:$0xff] %v3136_v34 }
 0x40c   : > { %v877_v33 = vpack.c.bf16 %v2098_v32, %v2093_v5  ;;  %v869_v37 = vpack.c.bf16 %v2101_v61, %v2096_v48  ;;  %v2231_v4 = vpop.eup %2230 }
 0x40d   : > { %v2102_v22 = vpop.trf.xlu0  ;;  %v1380_v59 = vpop.xlane.xlu1 %1379  ;;  %v3143_v14 = vmul.f32 %v2231_v4, %v3004_v51  ;;  %v3146_v10 = vmul.f32 %v2231_v4, %v3002_v30 }
 0x40e   : > { %1878 = vmatprep.subr.bf16.mxu0 %v877_v33  ;;  %2236 = vrcp.f32 %v1380_v59  ;;  %v2106_v20 = vunpack.i.h.bf16 %v2102_v22  ;;  %v2103_v44 = vunpack.i.l.bf16 %v2102_v22 }
 0x40f   : > { %1879 = vmatpush3.bf16.msra.mxu0 %v869_v37  ;;  %1613 = vst [vmem:[%s3084_s22 + $0x68] sm:$0xff] %v3143_v14  ;;  %1612 = vst [vmem:[%s3084_s22 + $0x60] sm:$0xff] %v3146_v10 }
 0x410   : > { %v2233_v54 = vpop.eup %2232 }
 0x411   : > { %v2107_v40 = vpop.trf.xlu0  ;;  %v1430_v23 = vmul.f32 %v2233_v54, %v3015_v2  ;;  %v1429_v51 = vmul.f32 %v2233_v54, %v3010_v8 }
 0x412   : > { %v2111_v58 = vunpack.i.h.bf16 %v2107_v40  ;;  %v2108_v38 = vunpack.i.l.bf16 %v2107_v40  ;;  %v1452_v40 = vpack.c.bf16 %v3133_v49, %v3123_v19 }
 0x413   : > { %1615 = vst [vmem:[%s3084_s22 + $0x78] sm:$0xff] %v1430_v23  ;;  %1614 = vst [vmem:[%s3084_s22 + $0x70] sm:$0xff] %v1429_v51 }
 0x414   : > { %v878_v42 = vpack.c.bf16 %v2108_v38, %v2103_v44  ;;  %v870_v30 = vpack.c.bf16 %v2111_v58, %v2106_v20  ;;  %v2235_v24 = vpop.eup %2234  ;;  %v1451_v58 = vpack.c.bf16 %v3136_v34, %v3126_v18  ;;  %v1454_v38 = vpack.c.bf16 %v1430_v23, %v3143_v14 }
 0x415   : > { %v2112_v63 = vpop.trf.xlu0  ;;  %v1432_v35 = vmul.f32 %v2235_v24, %v3021_v15  ;;  %v3158_v60 = vmul.f32 %v2235_v24, %v3019_v12 }
 0x416   : > { %1880 = vmatprep.subr.bf16.mxu0 %v878_v42  ;;  %v2116_v16 = vunpack.i.h.bf16 %v2112_v63  ;;  %v2113_v17 = vunpack.i.l.bf16 %v2112_v63 }
 0x417   : > { %1881 = vmatpush3.bf16.msra.mxu0 %v870_v30  ;;  %1617 = vst [vmem:[%s3084_s22 + $0x88] sm:$0xff] %v1432_v35  ;;  %1616 = vst [vmem:[%s3084_s22 + $0x80] sm:$0xff] %v3158_v60 }
 0x418   : > { %v2237_v2 = vpop.eup %2236 }
 0x419   : > { %v2117_v8 = vpop.trf.xlu0  ;;  %v1434_v29 = vmul.f32 %v2237_v2, %v3027_v0  ;;  %v1433_v28 = vmul.f32 %v2237_v2, %v3025_v52 }
 0x41a   : > { %v2121_v13 = vunpack.i.h.bf16 %v2117_v8  ;;  %v2118_v43 = vunpack.i.l.bf16 %v2117_v8 }
 0x41b   : > { %1619 = vst [vmem:[%s3084_s22 + $0x98] sm:$0xff] %v1434_v29  ;;  %1618 = vst [vmem:[%s3084_s22 + $0x90] sm:$0xff] %v1433_v28  ;;  %v1456_v7 = vpack.c.bf16 %v1434_v29, %v1432_v35  ;;  %v1455_v19 = vpack.c.bf16 %v1433_v28, %v3158_v60 }
 0x41c   : > { %v879_v48 = vpack.c.bf16 %v2118_v43, %v2113_v17  ;;  %v871_v5 = vpack.c.bf16 %v2121_v13, %v2116_v16 }
 0x41d   : > { %v2122_v15 = vpop.trf.xlu0 }
 0x41e   : > { %1882 = vmatprep.subr.bf16.mxu0 %v879_v48  ;;  %v2126_v12 = vunpack.i.h.bf16 %v2122_v15  ;;  %v2123_v1 = vunpack.i.l.bf16 %v2122_v15 }
 0x41f   : > { %1883 = vmatpush3.bf16.msra.mxu0 %v871_v5 }
 0x421   : > { %v2127_v61 = vpop.trf.xlu0 }
 0x422   : > { %v2131_v32 = vunpack.i.h.bf16 %v2127_v61  ;;  %v2128_v9 = vunpack.i.l.bf16 %v2127_v61 }
 0x424   : > { %v880_v33 = vpack.c.bf16 %v2128_v9, %v2123_v1  ;;  %v872_v37 = vpack.c.bf16 %v2131_v32, %v2126_v12 }
 0x425   : > { %v2132_v4 = vpop.trf.xlu0 }
 0x426   : > { %1884 = vmatprep.subr.bf16.mxu0 %v880_v33  ;;  %v2136_v0 = vunpack.i.h.bf16 %v2132_v4  ;;  %v2133_v22 = vunpack.i.l.bf16 %v2132_v4 }
 0x427   : > { %1885 = vmatpush3.bf16.msra.mxu0 %v872_v37 }
 0x429   : > { %v2137_v52 = vpop.trf.xlu0 }
 0x42a   : > { %v2141_v59 = vunpack.i.h.bf16 %v2137_v52  ;;  %v2138_v54 = vunpack.i.l.bf16 %v2137_v52 }
 0x42c   : > { %v873_v20 = vpack.c.bf16 %v2141_v59, %v2136_v0  ;;  %v881_v44 = vpack.c.bf16 %v2138_v54, %v2133_v22 }
 0x42e   : > { %1886 = vmatprep.subr.bf16.mxu0 %v881_v44 }
 0x42f   : > { %1887 = vmatpush3.bf16.msra.mxu0 %v873_v20 }
 0x432   : > { %1496 = vmatmul.mubr.bf16.vlgmr.msra.gmra.mrb[28].mxu0 %v1447_v27  ;;  %v1453_v27 = vpack.c.bf16 %v1429_v51, %v3146_v10 }
 0x433   : > { %1503 = vmatprep.mubr.bf16.mxu0 %v1450_v31 }
 0x43a   : > { %1504 = vmatmul.mubr.bf16.gmra.mrb[32].mxu0 %v1449_v3 }
 0x43b   : > { %1511 = vmatprep.mubr.bf16.mxu0 %v1452_v40 }
 0x442   : > { %1512 = vmatmul.mubr.bf16.gmra.mrb[36].mxu0 %v1451_v58  ;;  %v1383_v62 = vpop.xlane.xlu1 %1382 }
 0x443   : > { %1519 = vmatprep.mubr.bf16.mxu0 %v1454_v38  ;;  %2238 = vrcp.f32 %v1383_v62 }
 0x446   : > { %v1386_v6 = vpop.xlane.xlu1 %1385 }
 0x447   : > { %2240 = vrcp.f32 %v1386_v6 }
 0x44a   : > { %1520 = vmatmul.mubr.bf16.gmra.mrb[40].mxu0 %v1453_v27  ;;  %v1389_v47 = vpop.xlane.xlu1 %1388 }
 0x44b   : > { %1527 = vmatprep.mubr.bf16.mxu0 %v1456_v7  ;;  %2242 = vrcp.f32 %v1389_v47 }
 0x44d   : > { %v2239_v25 = vpop.eup %2238 }
 0x44e   : > { %v1392_v26 = vpop.xlane.xlu1 %1391  ;;  %v1436_v31 = vmul.f32 %v2239_v25, %v3044_v11  ;;  %v1435_v3 = vmul.f32 %v2239_v25, %v3041_v21 }
 0x44f   : > { %2244 = vrcp.f32 %v1392_v26 }
 0x450   : > { %1621 = vst [vmem:[%s3084_s22 + $0xa8] sm:$0xff] %v1436_v31  ;;  %1620 = vst [vmem:[%s3084_s22 + $0xa0] sm:$0xff] %v1435_v3 }
 0x451   : > { %v2241_v18 = vpop.eup %2240 }
 0x452   : > { %1528 = vmatmul.mubr.bf16.gmra.mrb[44].mxu0 %v1455_v19  ;;  %v1395_v49 = vpop.xlane.xlu1 %1394  ;;  %v1438_v34 = vmul.f32 %v2241_v18, %v3051_v41  ;;  %v1437_v14 = vmul.f32 %v2241_v18, %v3047_v56 }
 0x453   : > { %2246 = vrcp.f32 %v1395_v49 }
 0x454   : > { %v1458_v10 = vpack.c.bf16 %v1438_v34, %v1436_v31  ;;  %1623 = vst [vmem:[%s3084_s22 + $0xb8] sm:$0xff] %v1438_v34  ;;  %1622 = vst [vmem:[%s3084_s22 + $0xb0] sm:$0xff] %v1437_v14  ;;  %v1457_v42 = vpack.c.bf16 %v1437_v14, %v1435_v3 }
 0x455   : > { %v2243_v21 = vpop.eup %2242 }
 0x456   : > { %1535 = vmatprep.mubr.bf16.mxu0 %v1458_v10  ;;  %v1398_v11 = vpop.xlane.xlu1 %1397  ;;  %v1440_v23 = vmul.f32 %v2243_v21, %v3057_v36  ;;  %v1439_v51 = vmul.f32 %v2243_v21, %v3053_v57 }
 0x457   : > { %2248 = vrcp.f32 %v1398_v11 }
 0x458   : > { %1625 = vst [vmem:[%s3084_s22 + $0xc8] sm:$0xff] %v1440_v23  ;;  %1624 = vst [vmem:[%s3084_s22 + $0xc0] sm:$0xff] %v1439_v51 }
 0x459   : > { %v2245_v56 = vpop.eup %2244 }
 0x45a   : > { %1536 = vmatmul.mubr.bf16.gmra.mrb[48].mxu0 %v1457_v42  ;;  %v1442_v41 = vmul.f32 %v2245_v56, %v3063_v55  ;;  %v1441_v30 = vmul.f32 %v2245_v56, %v3059_v45 }
 0x45c   : > { %v1460_v24 = vpack.c.bf16 %v1442_v41, %v1440_v23  ;;  %1627 = vst [vmem:[%s3084_s22 + $0xd8] sm:$0xff] %v1442_v41  ;;  %1626 = vst [vmem:[%s3084_s22 + $0xd0] sm:$0xff] %v1441_v30  ;;  %v1459_v35 = vpack.c.bf16 %v1441_v30, %v1439_v51 }
 0x45d   : > { %v2247_v36 = vpop.eup %2246 }
 0x45e   : > { %1543 = vmatprep.mubr.bf16.mxu0 %v1460_v24  ;;  %v1444_v57 = vmul.f32 %v2247_v36, %v3069_v46  ;;  %v1443_v63 = vmul.f32 %v2247_v36, %v3065_v50 }
 0x460   : > { %1629 = vst [vmem:[%s3084_s22 + $0xe8] sm:$0xff] %v1444_v57  ;;  %1628 = vst [vmem:[%s3084_s22 + $0xe0] sm:$0xff] %v1443_v63 }
 0x461   : > { %v2249_v60 = vpop.eup %2248 }
 0x462   : > { %1544 = vmatmul.mubr.bf16.gmra.mrb[52].mxu0 %v1459_v35  ;;  %v1446_v55 = vmul.f32 %v2249_v60, %v3075_v53  ;;  %v1445_v45 = vmul.f32 %v2249_v60, %v3071_v39 }
 0x464   : > { %v1462_v2 = vpack.c.bf16 %v1446_v55, %v1444_v57  ;;  %1631 = vst [vmem:[%s3084_s22 + $0xf8] sm:$0xff] %v1446_v55  ;;  %1630 = vst [vmem:[%s3084_s22 + $0xf0] sm:$0xff] %v1445_v45  ;;  %v1461_v16 = vpack.c.bf16 %v1445_v45, %v1443_v63  ;;  %s2284_s22 = scalar_lea.vmem %s3210_s24, 4096 }
 0x465   : > { %p2285_p8 = scmp.ne.s32.totalorder %s3210_s24, %s2284_s22  ;;  %p2292_p1 = scmp.lt.s32.totalorder %s2290_s0, %s2284_s22 }
 0x466   : > { %1551 = vmatprep.mubr.bf16.mxu0 %v1462_v2 }
 0x467   : > { %p2286_p0 = pnand %p2285_p8, %p3347_p12  ;;  %p2293_p4 = por %p2292_p1, %p2291_p13 }
 0x469   : > { %p2287_p11 = pneg %p2286_p0 }
 0x46a   : > { %1552 = vmatmul.mubr.bf16.gmra.mrb[56].mxu0 %v1461_v16 }
 0x46b   : > { %p2294_p3 = pnand %p2293_p4, %p2287_p11 }
 0x505   : > { %v1888_v17 = vpop.f32.mrb[28].mxu0 }
 0x506   : > { %v1889_v8 = vpop.f32.mrb[29].mxu0 }
 0x507   : > { %v1890_v46 = vadd.f32 %v1889_v8, %v1888_v17  ;;  %v1891_v13 = vpop.f32.mrb[30].mxu0 }
 0x508   : > { %v1892_v50 = vpop.f32.mrb[31].mxu0 }
 0x509   : > { %v1893_v43 = vadd.f32 %v1892_v50, %v1891_v13  ;;  %1560 = vxpose.xlu1.b32.start [1/16] (narrow) %v1890_v46, 32 }
 0x50d   : > { %1561 = vxpose.xlu1.b32.cont [2/16] (narrow) %v1893_v43, 32  ;;  %v1894_v29 = vpop.f32.mrb[32].mxu0 }
 0x50e   : > { %v1895_v53 = vpop.f32.mrb[33].mxu0 }
 0x50f   : > { %v1896_v39 = vadd.f32 %v1895_v53, %v1894_v29  ;;  %v1897_v28 = vpop.f32.mrb[34].mxu0 }
 0x510   : > { %v1898_v48 = vpop.f32.mrb[35].mxu0 }
 0x511   : > { %v1899_v5 = vadd.f32 %v1898_v48, %v1897_v28  ;;  %1562 = vxpose.xlu1.b32.cont [3/16] (narrow) %v1896_v39, 32 }
 0x515   : > { %1563 = vxpose.xlu1.b32.cont [4/16] (narrow) %v1899_v5, 32  ;;  %v1900_v15 = vpop.f32.mrb[36].mxu0 }
 0x516   : > { %v1901_v12 = vpop.f32.mrb[37].mxu0 }
 0x517   : > { %v1902_v1 = vadd.f32 %v1901_v12, %v1900_v15  ;;  %v1903_v61 = vpop.f32.mrb[38].mxu0 }
 0x518   : > { %v1904_v32 = vpop.f32.mrb[39].mxu0 }
 0x519   : > { %v1905_v9 = vadd.f32 %v1904_v32, %v1903_v61  ;;  %1564 = vxpose.xlu1.b32.cont [5/16] (narrow) %v1902_v1, 32 }
 0x51d   : > { %1565 = vxpose.xlu1.b32.cont [6/16] (narrow) %v1905_v9, 32  ;;  %v1906_v33 = vpop.f32.mrb[40].mxu0 }
 0x51e   : > { %v1907_v37 = vpop.f32.mrb[41].mxu0 }
 0x51f   : > { %v1908_v4 = vadd.f32 %v1907_v37, %v1906_v33  ;;  %v1909_v0 = vpop.f32.mrb[42].mxu0 }
 0x520   : > { %v1910_v22 = vpop.f32.mrb[43].mxu0 }
 0x521   : > { %2297 = shalt.err (!%p2294_p3)
}
 0x522   : > { %s2298_s29 = scalar_lea.hbm %s3215_s12, 4096  ;;  %s2302_s3 = scalar_lea.hbm %s3346_s23, 16384 }
 0x523   : > { %p2299_p6 = scmp.ne.s32.totalorder %s3215_s12, %s2298_s29  ;;  %p2303_p5 = scmp.lt.u32.totalorder %s3215_s12, %s3346_s23 }
 0x524   : > { %p2304_p10 = scmp.lt.u32.totalorder %s2302_s3, %s2298_s29  ;;  %p2306_p8 = scmp.lt.u32.totalorder %s2298_s29, %s3215_s12 }
 0x525   : > { %p2300_p7 = pnand %p2299_p6, %p3347_p12 }
 0x526   : > { %p2305_p9 = por %p2304_p10, %p2303_p5 }
 0x527   : > { %p2301_p2 = pneg %p2300_p7 }
 0x528   : > { %p2307_p0 = por %p2306_p8, %p2305_p9 }
 0x52a   : > { %p2308_p11 = pnand %p2307_p0, %p2301_p2 }
 0x52c   : > { %2311 = shalt.err (!%p2308_p11)
}
 0x52d   : > { %s2422_s0 = smov 256   ;;  %s2423_s22 = smov 16   ;;  %v1911_v52 = vadd.f32 %v1910_v22, %v1909_v0  ;;  %1566 = vxpose.xlu1.b32.cont [7/16] (narrow) %v1908_v4, 32  ;;  %v1912_v59 = vpop.f32.mrb[44].mxu0  ;;  %v2250_v51 = vld [vmem:[%s2609_s26] sm:$0xff]  ;;  %v2251_v41 = vld [vmem:[%s2609_s26 + $0x8] sm:$0xff] }
 0x52e   : > { %1963 = dma.vmem_to_hbm [thread:$0]  (%p3347_p12), %s3210_s24, 4096, %s3215_s12, %s1638_s20, %s2422_s0, %s2422_s0, %s2423_s22   ;;  %v1913_v54 = vpop.f32.mrb[45].mxu0 }
 0x52f   : > { %v1914_v20 = vadd.f32 %v1913_v54, %v1912_v59  ;;  %v1915_v44 = vpop.f32.mrb[46].mxu0  ;;  %s3348_s20 = sshll.u32 %s2603_s19, 5  ;;  %s1852_s12 = sshll.u32 %s2402_s13, 3  ;;  %v2252_v36 = vld [vmem:[%s2609_s26 + $0x10] sm:$0xff]  ;;  %v2253_v35 = vld [vmem:[%s2609_s26 + $0x18] sm:$0xff] }
 0x530   : > { %v1916_v40 = vpop.f32.mrb[47].mxu0  ;;  %s388_s24 = scalar_lea.vmem [#allocation5], %s3348_s20  ;;  %s1649_s27 = sadd.s32 %s3344_s21, %s1852_s12 }
 0x531   : > { %1567 = vxpose.xlu1.b32.cont [8/16] (narrow) %v1911_v52, 32  ;;  %v1917_v58 = vadd.f32 %v1916_v40, %v1915_v44  ;;  %v1918_v38 = vpop.f32.mrb[48].mxu0  ;;  %s1652_s29 = sshll.u32 %s388_s24, 4  ;;  %s1853_s18 = sshll.u32 %s1649_s27, 7  ;;  %s3250_s29 = int_to_ptr.vmem [resolvable:$true] %s1652_s29 }
 0x532   : > { %v1919_v62 = vpop.f32.mrb[49].mxu0  ;;  %s3349_s3 = sld [smem:[#allocation17_spill]]  ;;  %s1633_s21 = scalar_lea.sflag [#allocation4], %s2603_s19 }
 0x533   : > { %v1920_v6 = vadd.f32 %v1919_v62, %v1918_v38  ;;  %v1921_v27 = vpop.f32.mrb[50].mxu0  ;;  %s2312_s9 = scalar_lea.vmem %s3250_s29, 512  ;;  %s2424_s22 = smov [#allocation5]  }
 0x534   : > { %v1922_v7 = vpop.f32.mrb[51].mxu0  ;;  %p2313_p13 = scmp.ne.s32.totalorder %s3250_s29, %s2312_s9  ;;  %s2316_s20 = sshll.u32 %s2424_s22, 4  ;;  %s2317_s20 = int_to_ptr.vmem [resolvable:$false] %s2316_s20 }
 0x535   : > { %1568 = vxpose.xlu1.b32.cont [9/16] (narrow) %v1914_v20, 32  ;;  %v1923_v47 = vadd.f32 %v1922_v7, %v1921_v27  ;;  %v1924_v25 = vpop.f32.mrb[52].mxu0  ;;  %s2318_s12 = scalar_lea.vmem %s2317_s20, 1024  ;;  %p2319_p3 = scmp.lt.s32.totalorder %s3250_s29, %s2317_s20 }
 0x536   : > { %v1925_v26 = vpop.f32.mrb[53].mxu0  ;;  %p2314_p1 = pnand %p2313_p13, %p3347_p12  ;;  %p2320_p6 = scmp.lt.s32.totalorder %s2318_s12, %s2312_s9 }
 0x537   : > { %v1926_v31 = vadd.f32 %v1925_v26, %v1924_v25  ;;  %v1927_v3 = vpop.f32.mrb[54].mxu0 }
 0x538   : > { %v1928_v19 = vpop.f32.mrb[55].mxu0  ;;  %s3256_s30 = scalar_lea.hbm %s3349_s3, %s1853_s18  ;;  %p2315_p4 = pneg %p2314_p1 }
 0x539   : > { %1569 = vxpose.xlu1.b32.cont [10/16] (narrow) %v1917_v58, 32  ;;  %v1929_v18 = vadd.f32 %v1928_v19, %v1927_v3  ;;  %p2321_p7 = por %p2320_p6, %p2319_p3 }
 0x53b   : > { %p2322_p2 = pnand %p2321_p7, %p2315_p4 }
 0x53d   : > { %1570 = vxpose.xlu1.b32.cont [11/16] (narrow) %v1920_v6, 32  ;;  %v1930_v49 = vpop.f32.mrb[56].mxu0 }
 0x53e   : > { %v1931_v34 = vpop.f32.mrb[57].mxu0 }
 0x53f   : > { %v1932_v14 = vadd.f32 %v1931_v34, %v1930_v49  ;;  %v1933_v10 = vpop.f32.mrb[58].mxu0 }
 0x540   : > { %v1934_v21 = vpop.f32.mrb[59].mxu0 }
 0x541   : > { %1571 = vxpose.xlu1.b32.cont [12/16] (narrow) %v1923_v47, 32  ;;  %v1935_v11 = vadd.f32 %v1934_v21, %v1933_v10 }
 0x545   : > { %1572 = vxpose.xlu1.b32.cont [13/16] (narrow) %v1926_v31, 32 }
 0x549   : > { %1573 = vxpose.xlu1.b32.cont [14/16] (narrow) %v1929_v18, 32 }
 0x54d   : > { %1574 = vxpose.xlu1.b32.cont [15/16] (narrow) %v1932_v14, 32 }
 0x551   : > { %1575 = vxpose.xlu1.b32.end [16/16] (narrow) %v1935_v11, 32 }
 0x595   : > { %v1576_v23 = vpop.trf.xlu1 }
 0x596   : > { %v1592_v42 = vadd.f32 %v2250_v51, %v1576_v23 }
 0x598   : > { %1596 = vst [vmem:[%s388_s24] sm:$0xff] %v1592_v42 }
 0x599   : > { %v1577_v56 = vpop.trf.xlu1 }
 0x59a   : > { %v1593_v30 = vadd.f32 %v2251_v41, %v1577_v56 }
 0x59c   : > { %1597 = vst [vmem:[%s388_s24 + $0x8] sm:$0xff] %v1593_v30 }
 0x59d   : > { %v1578_v24 = vpop.trf.xlu1 }
 0x59e   : > { %v1594_v57 = vadd.f32 %v2252_v36, %v1578_v24 }
 0x5a0   : > { %1598 = vst [vmem:[%s388_s24 + $0x10] sm:$0xff] %v1594_v57 }
 0x5a1   : > { %v1579_v63 = vpop.trf.xlu1 }
 0x5a2   : > { %v1595_v60 = vadd.f32 %v2253_v35, %v1579_v63 }
 0x5a4   : > { %1599 = vst [vmem:[%s388_s24 + $0x18] sm:$0xff] %v1595_v60 }
 0x5a5   : > { %2325 = shalt.err (!%p2322_p2)
}
 0x5a6   : > { %s2326_s26 = scalar_lea.hbm %s3256_s30, 512  ;;  %s2330_s18 = scalar_lea.hbm %s3349_s3, 2048 }
 0x5a7   : > { %p2327_p5 = scmp.ne.s32.totalorder %s3256_s30, %s2326_s26  ;;  %p2331_p8 = scmp.lt.u32.totalorder %s3256_s30, %s3349_s3 }
 0x5a8   : > { %p2332_p0 = scmp.lt.u32.totalorder %s2330_s18, %s2326_s26  ;;  %p2334_p13 = scmp.lt.u32.totalorder %s2326_s26, %s3256_s30 }
 0x5a9   : > { %p2328_p10 = pnand %p2327_p5, %p3347_p12 }
 0x5aa   : > { %p2333_p11 = por %p2332_p0, %p2331_p8 }
 0x5ab   : > { %p2329_p9 = pneg %p2328_p10 }
 0x5ac   : > { %p2335_p1 = por %p2334_p13, %p2333_p11 }
 0x5ae   : > { %p2336_p4 = pnand %p2335_p1, %p2329_p9 }
 0x5b0   : > { %2339 = shalt.err (!%p2336_p4)
}
 0x5b1   : > { %s2425_s9 = smov 128   ;;  %s2426_s22 = smov 8  }
 0x5b2   : > { %1962 = dma.vmem_to_hbm [thread:$0]  (%p3347_p12), %s3250_s29, 512, %s3256_s30, %s1633_s21, %s2425_s9, %s2422_s0, %s2426_s22  }
 0x5b3 PF: > { %s3350_s20 = sld [smem:[#allocation11_spill]]  ;;  %p1978_p3 = scmp.ge.s32.totalorder %s2414_s16, 2 }
 0x5b4   : > { %p3351_p6 = scmp.ne.s32.totalorder %s3340_s28, 0 }
 0x5b6   : > { %p1971_p7 = pnand %p1978_p3, %p3351_p6 }
 0x5b9   : > { %s1686_s12 = sand.u32 1, %s3350_s20  }
 0x5ba   : > { %s1687_s26 = scalar_lea.sflag [#allocation4], %s1686_s12 }
 0x5bb   : > { %2377 = dma.done.wait (!%p1971_p7), %s1687_s26, 512  }
 0x5bc   : > { %2379 = vsyncadd (!%p1971_p7), %s1687_s26, 4294966784  ;;  %s1696_s24 = scalar_lea.sflag [#allocation7], %s1686_s12 }
 0x5bd   : > { %2381 = dma.done.wait (!%p1971_p7), %s1696_s24, 4096  }
 0x5be   : > { %2383 = vsyncadd (!%p1971_p7), %s1696_s24, 4294963200  ;;  %s29_s16 = sadd.s32 1, %s2414_s16   ;;  %s3352_s25 = sld [smem:[#allocation13_spill]] }
 0x5bf   : > { %p26_p2 = scmp.ge.s32.totalorder %s29_s16, 6   ;;  %s3353_s19 = sld [smem:[#allocation14_spill]] }
 0x5c0   : > { %s3354_s30 = smov %s2390_s10  ;;  %s3355_s10 = smov %s2394_s11 }
 0x5c1   : > { %s3356_s11 = smov %s2555_s17  ;;  %s3357_s12 = smov %s2406_s14 }
 0x5c2   : > { %s3358_s13 = smov %s2410_s15  ;;  %28 = sbr.rel (!%p26_p2) target bundleno = 14 (0xe), region = 117 }
 0x5c4   : > { %s3359_s14 = smov %s3352_s25 }
 0x5c5   : > { %s3360_s15 = smov %s3353_s19 }
 0x5c9   :  { %1701 = vsyncpa [#allocation3], 1 }
 0x5ca   :  { %1703 = vsyncpa [#allocation3 + $0x1], 1 }
 0x5cb   :  { %1704 = vsyncpa [#allocation4], 1 }
 0x5cc   :  { %1706 = vsyncpa [#allocation4 + $0x1], 1 }
 0x5cd   :  { %1707 = vsyncpa [#allocation7], 1 }
 0x5ce   :  { %1709 = vsyncpa [#allocation7 + $0x1], 1 }

</bundles_post_ra>
